<compile_context>
chip_gen: v7x
topology: tpu7x:2x2x1
jax: 0.10.0
libtpu: 0.0.40
codegen_flags: <defaults>
</compile_context>

<pallas_src>
import functools
import math

import numpy as np
import jax
import jax.numpy as jnp
from jax.experimental import pallas as pl
from jax.experimental.pallas import tpu as pltpu

SCALE = math.sqrt(0.5)

# ----------------------------- hyper-params ----------------------------------
SRC_VOCAB = 20
TRG_VOCAB = 17
EMB_DIM = 32
HID_DIM = 32
KERNEL_SIZE = 3          # odd, as required by the encoder "same" padding
N_LAYERS = 2
MAX_LEN = 50
BATCH = 2
SRC_LEN = 8
TRG_LEN = 8

LANE = 128               # lane-dense width for logits / attention / slabs


# ============================== fused Pallas kernel ==========================
def _seq2seq_kernel(emb_ref, wmat_ref, wconv_ref, bias_ref,
                    logits_ref, attn_ref,
                    *, B, Ts, Tt, K, H, E, n_layers):
    f32 = jnp.float32
    BTs, BTt = B * Ts, B * Tt
    S_PAD = attn_ref.shape[1]            # 128: padded source-position width
    NEG = -1e30

    # ---- unpack weight slabs (static, sublane-aligned, one-time loads) ------
    enc_e2h_w  = wmat_ref[0 * H:1 * H, :H]
    enc_h2e_w  = wmat_ref[1 * H:2 * H, :E]
    dec_e2h_w  = wmat_ref[2 * H:3 * H, :H]
    attn_h2e_w = wmat_ref[3 * H:4 * H, :E]
    attn_e2h_w = wmat_ref[4 * H:5 * H, :H]
    w_out      = wmat_ref[5 * H:6 * H, :]            # [H, 128] fused hid2emb@fc

    def bias(i, width):
        return bias_ref[i:i + 1, :width]

    enc_e2h_b  = bias(0, H)
    enc_h2e_b  = bias(1 + n_layers, E)
    dec_e2h_b  = bias(2 + n_layers, H)
    attn_h2e_b = bias(3 + 2 * n_layers, E)
    attn_e2h_b = bias(4 + 2 * n_layers, H)
    b_out      = bias(5 + 2 * n_layers, LANE)

    def conv_w(sec, l, k):               # sec: 0 = encoder, 1 = decoder
        idx = (sec * n_layers + l) * K + k
        return wconv_ref[idx * H:(idx + 1) * H, :]   # [H, 2H]

    def conv_b(sec, l):
        return bias(1 + sec * (n_layers + 2) + l, 2 * H)

    # ---- hoisted iota masks (shared across all layers) ----------------------
    def time_index(T, rows):
        t = jax.lax.broadcasted_iota(jnp.int32, (rows, H), 0)
        for _ in range(B - 1):           # t = row % T (unrolled, no vector rem)
            t = jnp.where(t >= T, t - T, t)
        return t

    def shift_masks(T, rows, shifts):
        t = time_index(T, rows)
        return [((t + s >= 0) & (t + s < T)).astype(f32) for s in shifts]

    enc_shifts = [k - (K - 1) // 2 for k in range(K)]     # "same" padding
    dec_shifts = [k - (K - 1) for k in range(K)]          # causal padding
    enc_masks = shift_masks(Ts, BTs, enc_shifts)
    dec_masks = shift_masks(Tt, BTt, dec_shifts)

    # block-diagonal attention mask [B*Tt, 128]
    rowd = jax.lax.broadcasted_iota(jnp.int32, (BTt, S_PAD), 0)
    cold = jax.lax.broadcasted_iota(jnp.int32, (BTt, S_PAD), 1)
    attn_valid = functools.reduce(
        lambda a, c: a | c,
        [((rowd >= b * Tt) & (rowd < (b + 1) * Tt) &
          (cold >= b * Ts) & (cold < (b + 1) * Ts)) for b in range(B)])

    # ---- conv + GLU: sum over K shifted matmuls (no im2col) -----------------
    def conv_glu(x, sec, l, shifts, masks):
        rows = x.shape[0]
        acc = jnp.zeros((rows, 2 * H), f32) + conv_b(sec, l)
        for k, s in enumerate(shifts):
            if s == 0:
                xs = x
            else:
                sh = (-s) % rows                      # out[r] = x[r + s]
                xs = pltpu.roll(x, shift=sh, axis=0) * masks[k]
            acc = acc + jnp.dot(xs, conv_w(sec, l, k),
                                preferred_element_type=f32)
        return acc[:, :H] * jax.nn.sigmoid(acc[:, H:])

    # ------------------------------ encoder ----------------------------------
    emb_s = emb_ref[0:BTs, :]                                   # [B*Ts, E]
    x = jnp.dot(emb_s, enc_e2h_w, preferred_element_type=f32) + enc_e2h_b
    for l in range(n_layers):
        x = (conv_glu(x, 0, l, enc_shifts, enc_masks) + x) * SCALE
    enc_conved = jnp.dot(x, enc_h2e_w, preferred_element_type=f32) + enc_h2e_b
    enc_combined = (enc_conved + emb_s) * SCALE                 # [B*Ts, E]

    # pad source positions to 128 sublanes ONCE so attention dots are
    # full-lane-width and the attention store needs no lane concat.
    pad_rows = jnp.zeros((S_PAD - BTs, E), f32)
    enc_conved_p   = jnp.concatenate([enc_conved, pad_rows], axis=0)    # [128,E]
    enc_combined_p = jnp.concatenate([enc_combined, pad_rows], axis=0)  # [128,E]

    # ------------------------------ decoder ----------------------------------
    emb_t = emb_ref[BTs:BTs + BTt, :]                           # [B*Tt, E]
    x = jnp.dot(emb_t, dec_e2h_w, preferred_element_type=f32) + dec_e2h_b
    attn_last = jnp.zeros((BTt, S_PAD), f32)
    for l in range(n_layers):
        conved = conv_glu(x, 1, l, dec_shifts, dec_masks)       # [B*Tt, H]
        conved_emb = jnp.dot(conved, attn_h2e_w,
                             preferred_element_type=f32) + attn_h2e_b
        combined = (conved_emb + emb_t) * SCALE                 # [B*Tt, E]

        # batched block-diagonal attention, 128-lane wide
        energy = jax.lax.dot_general(combined, enc_conved_p,
                                     (((1,), (1,)), ((), ())),
                                     preferred_element_type=f32)  # [B*Tt,128]
        energy = jnp.where(attn_valid, energy, NEG)
        m = jnp.max(energy, axis=-1, keepdims=True)
        e = jnp.exp(energy - m)                    # invalid lanes -> exactly 0
        denom = jnp.sum(e, axis=-1, keepdims=True)
        # approx reciprocal (EUP): rows sum to 1 only to ~1e-4 (documented).
        attn = e * pl.reciprocal(denom, approx=True)
        attended = jnp.dot(attn, enc_combined_p,
                           preferred_element_type=f32)          # [B*Tt, E]
        attended = jnp.dot(attended, attn_e2h_w,
                           preferred_element_type=f32) + attn_e2h_b
        x = ((conved + attended) * SCALE + x) * SCALE
        attn_last = attn

    # fused dec_hid2emb @ fc_out : single [B*Tt,H] x [H,128] dot, full store.
    logits_ref[...] = jnp.dot(x, w_out, preferred_element_type=f32) + b_out
    attn_ref[...] = attn_last                       # full 128-lane store


# ====================== one-time weight repacking (hoisted) ==================
def prepare_params(p):
    f32 = jnp.float32
    H, E, K, L = HID_DIM, EMB_DIM, KERNEL_SIZE, N_LAYERS

    # fuse dec_hid2emb with lane-padded fc_out
    fc_w_pad = jnp.zeros((E, LANE), f32).at[:, :TRG_VOCAB].set(p["dec_fc_out_w"])
    fc_b_pad = jnp.zeros((LANE,), f32).at[:TRG_VOCAB].set(p["dec_fc_out_b"])
    w_out = p["dec_hid2emb_w"] @ fc_w_pad                        # [H, 128]
    b_out = p["dec_hid2emb_b"] @ fc_w_pad + fc_b_pad             # [128]

    def pad128(w):
        return jnp.zeros((w.shape[0], LANE), f32).at[:, :w.shape[1]].set(w)

    wmat = jnp.concatenate([
        pad128(p["enc_emb2hid_w"]),
        pad128(p["enc_hid2emb_w"]),
        pad128(p["dec_emb2hid_w"]),
        pad128(p["dec_attn_hid2emb_w"]),
        pad128(p["dec_attn_emb2hid_w"]),
        w_out,
    ], axis=0)                                                   # [6H, 128]

    wconv = jnp.concatenate(
        [p["enc_conv_w"][l][k] for l in range(L) for k in range(K)]
        + [p["dec_conv_w"][l][k] for l in range(L) for k in range(K)],
        axis=0)                                                  # [4*K*H, 2H]

    def brow(b):
        return jnp.zeros((1, LANE), f32).at[0, :b.shape[0]].set(b)

    bias_slab = jnp.concatenate(
        [brow(p["enc_emb2hid_b"])]
        + [brow(p["enc_conv_b"][l]) for l in range(L)]
        + [brow(p["enc_hid2emb_b"])]
        + [brow(p["dec_emb2hid_b"])]
        + [brow(p["dec_conv_b"][l]) for l in range(L)]
        + [brow(p["dec_attn_hid2emb_b"])]
        + [brow(p["dec_attn_emb2hid_b"])]
        + [brow(b_out)],
        axis=0)                                                  # [2L+6, 128]

    return {
        "enc_tok_emb": p["enc_tok_emb"], "enc_pos_emb": p["enc_pos_emb"],
        "dec_tok_emb": p["dec_tok_emb"], "dec_pos_emb": p["dec_pos_emb"],
        "wmat": wmat, "wconv": wconv, "bias": bias_slab,
    }


# ============================ model forward (jitted) =========================
@jax.jit
def seq2seq_forward(src, trg, packed):
    B, Ts = src.shape
    _, Tt = trg.shape

    # Embedding gathers stay in (jitted) JAX — no clean Pallas win at this size.
    emb_s = (packed["enc_tok_emb"][src]
             + packed["enc_pos_emb"][:Ts][None]).reshape(B * Ts, EMB_DIM)
    emb_t = (packed["dec_tok_emb"][trg]
             + packed["dec_pos_emb"][:Tt][None]).reshape(B * Tt, EMB_DIM)
    emb = jnp.concatenate([emb_s, emb_t], axis=0).astype(jnp.float32)

    kernel = functools.partial(
        _seq2seq_kernel, B=B, Ts=Ts, Tt=Tt, K=KERNEL_SIZE,
        H=HID_DIM, E=EMB_DIM, n_layers=N_LAYERS)

    logits_pad, attn_pad = pl.pallas_call(
        kernel,
        out_shape=(jax.ShapeDtypeStruct((B * Tt, LANE), jnp.float32),
                   jax.ShapeDtypeStruct((B * Tt, LANE), jnp.float32)),
    )(emb, packed["wmat"], packed["wconv"], packed["bias"])

    output = logits_pad[:, :TRG_VOCAB].reshape(B, Tt, TRG_VOCAB)
    attn_blocks = attn_pad.reshape(B, Tt, LANE)
    attention = jnp.stack(
        [attn_blocks[b, :, b * Ts:(b + 1) * Ts] for b in range(B)], axis=0)
    return output, attention


# ========================= pure-JAX reference (check) ========================
def _ref_conv_glu(x, w, b, causal):
    B, T, _ = x.shape
    K = w.shape[0]
    Hout = w.shape[2] // 2
    if causal:
        xpad = jnp.pad(x, ((0, 0), (K - 1, 0), (0, 0)))
    else:
        pd = (K - 1) // 2
        xpad = jnp.pad(x, ((0, 0), (pd, pd), (0, 0)))
    acc = jnp.zeros((B, T, w.shape[2])) + b
    for k in range(K):
        acc = acc + jnp.einsum("btc,cd->btd", xpad[:, k:k + T], w[k])
    return acc[..., :Hout] * jax.nn.sigmoid(acc[..., Hout:])


def ref_forward(src, trg, p):
    B, Ts = src.shape
    emb_s = p["enc_tok_emb"][src] + p["enc_pos_emb"][jnp.arange(Ts)][None]
    ci = emb_s @ p["enc_emb2hid_w"] + p["enc_emb2hid_b"]
    for l in range(N_LAYERS):
        c = _ref_conv_glu(ci, p["enc_conv_w"][l], p["enc_conv_b"][l], causal=False)
        ci = (c + ci) * SCALE
    enc_conved = ci @ p["enc_hid2emb_w"] + p["enc_hid2emb_b"]
    enc_combined = (enc_conved + emb_s) * SCALE

    B, Tt = trg.shape
    emb_t = p["dec_tok_emb"][trg] + p["dec_pos_emb"][jnp.arange(Tt)][None]
    ci = emb_t @ p["dec_emb2hid_w"] + p["dec_emb2hid_b"]
    attention = None
    for l in range(N_LAYERS):
        c = _ref_conv_glu(ci, p["dec_conv_w"][l], p["dec_conv_b"][l], causal=True)
        ce = c @ p["dec_attn_hid2emb_w"] + p["dec_attn_hid2emb_b"]
        comb = (ce + emb_t) * SCALE
        energy = jnp.einsum("bte,bse->bts", comb, enc_conved)
        attention = jax.nn.softmax(energy, axis=-1)
        att = jnp.einsum("bts,bse->bte", attention, enc_combined)
        att = att @ p["dec_attn_emb2hid_w"] + p["dec_attn_emb2hid_b"]
        c = (c + att) * SCALE
        ci = (c + ci) * SCALE
    conved_e = ci @ p["dec_hid2emb_w"] + p["dec_hid2emb_b"]
    output = conved_e @ p["dec_fc_out_w"] + p["dec_fc_out_b"]
    return output, attention


# ================================ params =====================================
def init_params(key):
    def norm(k, shape):
        return 0.1 * jax.random.normal(k, shape, jnp.float32)

    keys = iter(jax.random.split(key, 64))
    p = {
        "enc_tok_emb": norm(next(keys), (SRC_VOCAB, EMB_DIM)),
        "enc_pos_emb": norm(next(keys), (MAX_LEN, EMB_DIM)),
        "enc_emb2hid_w": norm(next(keys), (EMB_DIM, HID_DIM)),
        "enc_emb2hid_b": norm(next(keys), (HID_DIM,)),
        "enc_hid2emb_w": norm(next(keys), (HID_DIM, EMB_DIM)),
        "enc_hid2emb_b": norm(next(keys), (EMB_DIM,)),
        "dec_tok_emb": norm(next(keys), (TRG_VOCAB, EMB_DIM)),
        "dec_pos_emb": norm(next(keys), (MAX_LEN, EMB_DIM)),
        "dec_emb2hid_w": norm(next(keys), (EMB_DIM, HID_DIM)),
        "dec_emb2hid_b": norm(next(keys), (HID_DIM,)),
        "dec_hid2emb_w": norm(next(keys), (HID_DIM, EMB_DIM)),
        "dec_hid2emb_b": norm(next(keys), (EMB_DIM,)),
        "dec_attn_hid2emb_w": norm(next(keys), (HID_DIM, EMB_DIM)),
        "dec_attn_hid2emb_b": norm(next(keys), (EMB_DIM,)),
        "dec_attn_emb2hid_w": norm(next(keys), (EMB_DIM, HID_DIM)),
        "dec_attn_emb2hid_b": norm(next(keys), (HID_DIM,)),
        "dec_fc_out_w": norm(next(keys), (EMB_DIM, TRG_VOCAB)),
        "dec_fc_out_b": norm(next(keys), (TRG_VOCAB,)),
        # conv weights stored as [K, in_ch, 2*hid] (converted from torch [2H,H,K])
        "enc_conv_w": [norm(next(keys), (KERNEL_SIZE, HID_DIM, 2 * HID_DIM))
                       for _ in range(N_LAYERS)],
        "enc_conv_b": [norm(next(keys), (2 * HID_DIM,)) for _ in range(N_LAYERS)],
        "dec_conv_w": [norm(next(keys), (KERNEL_SIZE, HID_DIM, 2 * HID_DIM))
                       for _ in range(N_LAYERS)],
        "dec_conv_b": [norm(next(keys), (2 * HID_DIM,)) for _ in range(N_LAYERS)],
    }
    return p


if __name__ == "__main__":
    key = jax.random.PRNGKey(0)
    kp, ks, kt = jax.random.split(key, 3)
    params = init_params(kp)
    packed = prepare_params(params)           # one-time repack, out of hot path
    src = jax.random.randint(ks, (BATCH, SRC_LEN), 0, SRC_VOCAB, dtype=jnp.int32)
    trg = jax.random.randint(kt, (BATCH, TRG_LEN), 0, TRG_VOCAB, dtype=jnp.int32)

    out, attn = seq2seq_forward(src, trg, packed)
    out = jax.block_until_ready(out)
    attn = jax.block_until_ready(attn)

    ref_out, ref_attn = ref_forward(src, trg, params)
    # relaxed tolerance: softmax denominator uses EUP approx reciprocal and the
    # hid2emb/fc_out fusion re-associates one matmul.
    np.testing.assert_allclose(np.asarray(out), np.asarray(ref_out),
                               rtol=2e-3, atol=2e-3)
    np.testing.assert_allclose(np.asarray(attn), np.asarray(ref_attn),
                               rtol=2e-3, atol=2e-3)
    assert out.shape == (BATCH, TRG_LEN, TRG_VOCAB)
    assert attn.shape == (BATCH, TRG_LEN, SRC_LEN)
    print("KERNEL_OK")
</pallas_src>

<mosaic_0001>
module attributes {stable_mosaic.version = 11 : i64} {
  func.func @_seq2seq_kernel(%arg0: memref<32x32xf32, #tpu.memory_space<vmem>>, %arg1: memref<192x128xf32, #tpu.memory_space<vmem>>, %arg2: memref<384x64xf32, #tpu.memory_space<vmem>>, %arg3: memref<10x128xf32, #tpu.memory_space<vmem>>, %arg4: memref<16x128xf32, #tpu.memory_space<vmem>>, %arg5: memref<16x128xf32, #tpu.memory_space<vmem>>) attributes {dimension_semantics = [], scalar_prefetch = 0 : i64, scratch_operands = 0 : i64, tpu.core_type = #tpu.core_type<tc>} {
    %c0 = arith.constant 0 : index
    %c0_0 = arith.constant 0 : index
    %0 = vector.load %arg1[%c0, %c0_0] : memref<192x128xf32, #tpu.memory_space<vmem>>, vector<32x32xf32>
    %c32 = arith.constant 32 : index
    %c0_1 = arith.constant 0 : index
    %1 = vector.load %arg1[%c32, %c0_1] : memref<192x128xf32, #tpu.memory_space<vmem>>, vector<32x32xf32>
    %c64 = arith.constant 64 : index
    %c0_2 = arith.constant 0 : index
    %2 = vector.load %arg1[%c64, %c0_2] : memref<192x128xf32, #tpu.memory_space<vmem>>, vector<32x32xf32>
    %c96 = arith.constant 96 : index
    %c0_3 = arith.constant 0 : index
    %3 = vector.load %arg1[%c96, %c0_3] : memref<192x128xf32, #tpu.memory_space<vmem>>, vector<32x32xf32>
    %c128 = arith.constant 128 : index
    %c0_4 = arith.constant 0 : index
    %4 = vector.load %arg1[%c128, %c0_4] : memref<192x128xf32, #tpu.memory_space<vmem>>, vector<32x32xf32>
    %c160 = arith.constant 160 : index
    %c0_5 = arith.constant 0 : index
    %5 = vector.load %arg1[%c160, %c0_5] : memref<192x128xf32, #tpu.memory_space<vmem>>, vector<32x128xf32>
    %c0_6 = arith.constant 0 : index
    %c0_7 = arith.constant 0 : index
    %6 = vector.load %arg3[%c0_6, %c0_7] : memref<10x128xf32, #tpu.memory_space<vmem>>, vector<1x32xf32>
    %c3 = arith.constant 3 : index
    %c0_8 = arith.constant 0 : index
    %7 = vector.load %arg3[%c3, %c0_8] : memref<10x128xf32, #tpu.memory_space<vmem>>, vector<1x32xf32>
    %c4 = arith.constant 4 : index
    %c0_9 = arith.constant 0 : index
    %8 = vector.load %arg3[%c4, %c0_9] : memref<10x128xf32, #tpu.memory_space<vmem>>, vector<1x32xf32>
    %c7 = arith.constant 7 : index
    %c0_10 = arith.constant 0 : index
    %9 = vector.load %arg3[%c7, %c0_10] : memref<10x128xf32, #tpu.memory_space<vmem>>, vector<1x32xf32>
    %c8 = arith.constant 8 : index
    %c0_11 = arith.constant 0 : index
    %10 = vector.load %arg3[%c8, %c0_11] : memref<10x128xf32, #tpu.memory_space<vmem>>, vector<1x32xf32>
    %c9 = arith.constant 9 : index
    %c0_12 = arith.constant 0 : index
    %11 = vector.load %arg3[%c9, %c0_12] : memref<10x128xf32, #tpu.memory_space<vmem>>, vector<1x128xf32>
    %12 = tpu.iota {dimensions = array<i32: 0>} : vector<16x32xi32>
    %c8_i32 = arith.constant 8 : i32
    %13 = vector.broadcast %c8_i32 : i32 to vector<16x32xi32>
    %14 = arith.cmpi sge, %12, %13 : vector<16x32xi32>
    %c8_i32_13 = arith.constant 8 : i32
    %15 = vector.broadcast %c8_i32_13 : i32 to vector<16x32xi32>
    %16 = arith.subi %12, %15 : vector<16x32xi32>
    %17 = arith.select %14, %16, %12 : vector<16x32xi1>, vector<16x32xi32>
    %c-1_i32 = arith.constant -1 : i32
    %18 = vector.broadcast %c-1_i32 : i32 to vector<16x32xi32>
    %19 = arith.addi %17, %18 : vector<16x32xi32>
    %c0_i32 = arith.constant 0 : i32
    %20 = vector.broadcast %c0_i32 : i32 to vector<16x32xi32>
    %21 = arith.cmpi sge, %19, %20 : vector<16x32xi32>
    %c-1_i32_14 = arith.constant -1 : i32
    %22 = vector.broadcast %c-1_i32_14 : i32 to vector<16x32xi32>
    %23 = arith.addi %17, %22 : vector<16x32xi32>
    %c8_i32_15 = arith.constant 8 : i32
    %24 = vector.broadcast %c8_i32_15 : i32 to vector<16x32xi32>
    %25 = arith.cmpi slt, %23, %24 : vector<16x32xi32>
    %26 = arith.andi %21, %25 : vector<16x32xi1>
    %27 = arith.extui %26 : vector<16x32xi1> to vector<16x32xi32>
    %28 = arith.sitofp %27 : vector<16x32xi32> to vector<16x32xf32>
    %c1_i32 = arith.constant 1 : i32
    %29 = vector.broadcast %c1_i32 : i32 to vector<16x32xi32>
    %30 = arith.addi %17, %29 : vector<16x32xi32>
    %c0_i32_16 = arith.constant 0 : i32
    %31 = vector.broadcast %c0_i32_16 : i32 to vector<16x32xi32>
    %32 = arith.cmpi sge, %30, %31 : vector<16x32xi32>
    %c1_i32_17 = arith.constant 1 : i32
    %33 = vector.broadcast %c1_i32_17 : i32 to vector<16x32xi32>
    %34 = arith.addi %17, %33 : vector<16x32xi32>
    %c8_i32_18 = arith.constant 8 : i32
    %35 = vector.broadcast %c8_i32_18 : i32 to vector<16x32xi32>
    %36 = arith.cmpi slt, %34, %35 : vector<16x32xi32>
    %37 = arith.andi %32, %36 : vector<16x32xi1>
    %38 = arith.extui %37 : vector<16x32xi1> to vector<16x32xi32>
    %39 = arith.sitofp %38 : vector<16x32xi32> to vector<16x32xf32>
    %40 = tpu.iota {dimensions = array<i32: 0>} : vector<16x32xi32>
    %c8_i32_19 = arith.constant 8 : i32
    %41 = vector.broadcast %c8_i32_19 : i32 to vector<16x32xi32>
    %42 = arith.cmpi sge, %40, %41 : vector<16x32xi32>
    %c8_i32_20 = arith.constant 8 : i32
    %43 = vector.broadcast %c8_i32_20 : i32 to vector<16x32xi32>
    %44 = arith.subi %40, %43 : vector<16x32xi32>
    %45 = arith.select %42, %44, %40 : vector<16x32xi1>, vector<16x32xi32>
    %c-2_i32 = arith.constant -2 : i32
    %46 = vector.broadcast %c-2_i32 : i32 to vector<16x32xi32>
    %47 = arith.addi %45, %46 : vector<16x32xi32>
    %c0_i32_21 = arith.constant 0 : i32
    %48 = vector.broadcast %c0_i32_21 : i32 to vector<16x32xi32>
    %49 = arith.cmpi sge, %47, %48 : vector<16x32xi32>
    %c-2_i32_22 = arith.constant -2 : i32
    %50 = vector.broadcast %c-2_i32_22 : i32 to vector<16x32xi32>
    %51 = arith.addi %45, %50 : vector<16x32xi32>
    %c8_i32_23 = arith.constant 8 : i32
    %52 = vector.broadcast %c8_i32_23 : i32 to vector<16x32xi32>
    %53 = arith.cmpi slt, %51, %52 : vector<16x32xi32>
    %54 = arith.andi %49, %53 : vector<16x32xi1>
    %55 = arith.extui %54 : vector<16x32xi1> to vector<16x32xi32>
    %56 = arith.sitofp %55 : vector<16x32xi32> to vector<16x32xf32>
    %c-1_i32_24 = arith.constant -1 : i32
    %57 = vector.broadcast %c-1_i32_24 : i32 to vector<16x32xi32>
    %58 = arith.addi %45, %57 : vector<16x32xi32>
    %c0_i32_25 = arith.constant 0 : i32
    %59 = vector.broadcast %c0_i32_25 : i32 to vector<16x32xi32>
    %60 = arith.cmpi sge, %58, %59 : vector<16x32xi32>
    %c-1_i32_26 = arith.constant -1 : i32
    %61 = vector.broadcast %c-1_i32_26 : i32 to vector<16x32xi32>
    %62 = arith.addi %45, %61 : vector<16x32xi32>
    %c8_i32_27 = arith.constant 8 : i32
    %63 = vector.broadcast %c8_i32_27 : i32 to vector<16x32xi32>
    %64 = arith.cmpi slt, %62, %63 : vector<16x32xi32>
    %65 = arith.andi %60, %64 : vector<16x32xi1>
    %66 = arith.extui %65 : vector<16x32xi1> to vector<16x32xi32>
    %67 = arith.sitofp %66 : vector<16x32xi32> to vector<16x32xf32>
    %68 = tpu.iota {dimensions = array<i32: 0>} : vector<16x128xi32>
    %69 = tpu.iota {dimensions = array<i32: 1>} : vector<16x128xi32>
    %c0_i32_28 = arith.constant 0 : i32
    %70 = vector.broadcast %c0_i32_28 : i32 to vector<16x128xi32>
    %71 = arith.cmpi sge, %68, %70 : vector<16x128xi32>
    %c8_i32_29 = arith.constant 8 : i32
    %72 = vector.broadcast %c8_i32_29 : i32 to vector<16x128xi32>
    %73 = arith.cmpi slt, %68, %72 : vector<16x128xi32>
    %74 = arith.andi %71, %73 : vector<16x128xi1>
    %c0_i32_30 = arith.constant 0 : i32
    %75 = vector.broadcast %c0_i32_30 : i32 to vector<16x128xi32>
    %76 = arith.cmpi sge, %69, %75 : vector<16x128xi32>
    %77 = arith.andi %74, %76 : vector<16x128xi1>
    %c8_i32_31 = arith.constant 8 : i32
    %78 = vector.broadcast %c8_i32_31 : i32 to vector<16x128xi32>
    %79 = arith.cmpi slt, %69, %78 : vector<16x128xi32>
    %80 = arith.andi %77, %79 : vector<16x128xi1>
    %c8_i32_32 = arith.constant 8 : i32
    %81 = vector.broadcast %c8_i32_32 : i32 to vector<16x128xi32>
    %82 = arith.cmpi sge, %68, %81 : vector<16x128xi32>
    %c16_i32 = arith.constant 16 : i32
    %83 = vector.broadcast %c16_i32 : i32 to vector<16x128xi32>
    %84 = arith.cmpi slt, %68, %83 : vector<16x128xi32>
    %85 = arith.andi %82, %84 : vector<16x128xi1>
    %c8_i32_33 = arith.constant 8 : i32
    %86 = vector.broadcast %c8_i32_33 : i32 to vector<16x128xi32>
    %87 = arith.cmpi sge, %69, %86 : vector<16x128xi32>
    %88 = arith.andi %85, %87 : vector<16x128xi1>
    %c16_i32_34 = arith.constant 16 : i32
    %89 = vector.broadcast %c16_i32_34 : i32 to vector<16x128xi32>
    %90 = arith.cmpi slt, %69, %89 : vector<16x128xi32>
    %91 = arith.andi %88, %90 : vector<16x128xi1>
    %92 = arith.ori %80, %91 : vector<16x128xi1>
    %c0_35 = arith.constant 0 : index
    %c0_36 = arith.constant 0 : index
    %93 = vector.load %arg0[%c0_35, %c0_36] : memref<32x32xf32, #tpu.memory_space<vmem>>, vector<16x32xf32>
    %cst = arith.constant dense<0.000000e+00> : vector<16x32xf32>
    %94 = tpu.matmul %93, %0, %cst {dimension_numbers = #tpu.dot_dimension_numbers<[1], [0], [0], [1], [0, 0, 1, 1], [], []>} : vector<16x32xf32>, vector<32x32xf32>, vector<16x32xf32> -> vector<16x32xf32>
    %95 = vector.broadcast %6 : vector<1x32xf32> to vector<16x32xf32>
    %96 = arith.addf %94, %95 : vector<16x32xf32>
    %cst_37 = arith.constant 0.000000e+00 : f32
    %97 = vector.broadcast %cst_37 : f32 to vector<16x64xf32>
    %c1 = arith.constant 1 : index
    %c0_38 = arith.constant 0 : index
    %98 = vector.load %arg3[%c1, %c0_38] : memref<10x128xf32, #tpu.memory_space<vmem>>, vector<1x64xf32>
    %99 = vector.broadcast %98 : vector<1x64xf32> to vector<16x64xf32>
    %100 = arith.addf %97, %99 : vector<16x64xf32>
    %c1_i32_39 = arith.constant 1 : i32
    %101 = tpu.dynamic_rotate %96 by %c1_i32_39 dim 0 : vector<16x32xf32>, i32 -> vector<16x32xf32>
    %102 = arith.mulf %101, %28 : vector<16x32xf32>
    %c0_40 = arith.constant 0 : index
    %c0_41 = arith.constant 0 : index
    %103 = vector.load %arg2[%c0_40, %c0_41] : memref<384x64xf32, #tpu.memory_space<vmem>>, vector<32x64xf32>
    %cst_42 = arith.constant dense<0.000000e+00> : vector<16x64xf32>
    %104 = tpu.matmul %102, %103, %cst_42 {dimension_numbers = #tpu.dot_dimension_numbers<[1], [0], [0], [1], [0, 0, 1, 1], [], []>} : vector<16x32xf32>, vector<32x64xf32>, vector<16x64xf32> -> vector<16x64xf32>
    %105 = arith.addf %100, %104 : vector<16x64xf32>
    %c32_43 = arith.constant 32 : index
    %c0_44 = arith.constant 0 : index
    %106 = vector.load %arg2[%c32_43, %c0_44] : memref<384x64xf32, #tpu.memory_space<vmem>>, vector<32x64xf32>
    %cst_45 = arith.constant dense<0.000000e+00> : vector<16x64xf32>
    %107 = tpu.matmul %96, %106, %cst_45 {dimension_numbers = #tpu.dot_dimension_numbers<[1], [0], [0], [1], [0, 0, 1, 1], [], []>} : vector<16x32xf32>, vector<32x64xf32>, vector<16x64xf32> -> vector<16x64xf32>
    %108 = arith.addf %105, %107 : vector<16x64xf32>
    %c15_i32 = arith.constant 15 : i32
    %109 = tpu.dynamic_rotate %96 by %c15_i32 dim 0 : vector<16x32xf32>, i32 -> vector<16x32xf32>
    %110 = arith.mulf %109, %39 : vector<16x32xf32>
    %c64_46 = arith.constant 64 : index
    %c0_47 = arith.constant 0 : index
    %111 = vector.load %arg2[%c64_46, %c0_47] : memref<384x64xf32, #tpu.memory_space<vmem>>, vector<32x64xf32>
    %cst_48 = arith.constant dense<0.000000e+00> : vector<16x64xf32>
    %112 = tpu.matmul %110, %111, %cst_48 {dimension_numbers = #tpu.dot_dimension_numbers<[1], [0], [0], [1], [0, 0, 1, 1], [], []>} : vector<16x32xf32>, vector<32x64xf32>, vector<16x64xf32> -> vector<16x64xf32>
    %113 = arith.addf %108, %112 : vector<16x64xf32>
    %114 = vector.extract_strided_slice %113 {offsets = [0, 0], sizes = [16, 32], strides = [1, 1]} : vector<16x64xf32> to vector<16x32xf32>
    %115 = vector.extract_strided_slice %113 {offsets = [0, 32], sizes = [16, 32], strides = [1, 1]} : vector<16x64xf32> to vector<16x32xf32>
    %116 = arith.negf %115 : vector<16x32xf32>
    %117 = math.exp %116 : vector<16x32xf32>
    %cst_49 = arith.constant 1.000000e+00 : f32
    %118 = vector.broadcast %cst_49 : f32 to vector<16x32xf32>
    %119 = arith.addf %118, %117 : vector<16x32xf32>
    %120 = arith.divf %118, %119 : vector<16x32xf32>
    %121 = arith.mulf %114, %120 : vector<16x32xf32>
    %122 = arith.addf %121, %96 : vector<16x32xf32>
    %cst_50 = arith.constant 0.707106769 : f32
    %123 = vector.broadcast %cst_50 : f32 to vector<16x32xf32>
    %124 = arith.mulf %122, %123 : vector<16x32xf32>
    %cst_51 = arith.constant 0.000000e+00 : f32
    %125 = vector.broadcast %cst_51 : f32 to vector<16x64xf32>
    %c2 = arith.constant 2 : index
    %c0_52 = arith.constant 0 : index
    %126 = vector.load %arg3[%c2, %c0_52] : memref<10x128xf32, #tpu.memory_space<vmem>>, vector<1x64xf32>
    %127 = vector.broadcast %126 : vector<1x64xf32> to vector<16x64xf32>
    %128 = arith.addf %125, %127 : vector<16x64xf32>
    %c1_i32_53 = arith.constant 1 : i32
    %129 = tpu.dynamic_rotate %124 by %c1_i32_53 dim 0 : vector<16x32xf32>, i32 -> vector<16x32xf32>
    %130 = arith.mulf %129, %28 : vector<16x32xf32>
    %c96_54 = arith.constant 96 : index
    %c0_55 = arith.constant 0 : index
    %131 = vector.load %arg2[%c96_54, %c0_55] : memref<384x64xf32, #tpu.memory_space<vmem>>, vector<32x64xf32>
    %cst_56 = arith.constant dense<0.000000e+00> : vector<16x64xf32>
    %132 = tpu.matmul %130, %131, %cst_56 {dimension_numbers = #tpu.dot_dimension_numbers<[1], [0], [0], [1], [0, 0, 1, 1], [], []>} : vector<16x32xf32>, vector<32x64xf32>, vector<16x64xf32> -> vector<16x64xf32>
    %133 = arith.addf %128, %132 : vector<16x64xf32>
    %c128_57 = arith.constant 128 : index
    %c0_58 = arith.constant 0 : index
    %134 = vector.load %arg2[%c128_57, %c0_58] : memref<384x64xf32, #tpu.memory_space<vmem>>, vector<32x64xf32>
    %cst_59 = arith.constant dense<0.000000e+00> : vector<16x64xf32>
    %135 = tpu.matmul %124, %134, %cst_59 {dimension_numbers = #tpu.dot_dimension_numbers<[1], [0], [0], [1], [0, 0, 1, 1], [], []>} : vector<16x32xf32>, vector<32x64xf32>, vector<16x64xf32> -> vector<16x64xf32>
    %136 = arith.addf %133, %135 : vector<16x64xf32>
    %c15_i32_60 = arith.constant 15 : i32
    %137 = tpu.dynamic_rotate %124 by %c15_i32_60 dim 0 : vector<16x32xf32>, i32 -> vector<16x32xf32>
    %138 = arith.mulf %137, %39 : vector<16x32xf32>
    %c160_61 = arith.constant 160 : index
    %c0_62 = arith.constant 0 : index
    %139 = vector.load %arg2[%c160_61, %c0_62] : memref<384x64xf32, #tpu.memory_space<vmem>>, vector<32x64xf32>
    %cst_63 = arith.constant dense<0.000000e+00> : vector<16x64xf32>
    %140 = tpu.matmul %138, %139, %cst_63 {dimension_numbers = #tpu.dot_dimension_numbers<[1], [0], [0], [1], [0, 0, 1, 1], [], []>} : vector<16x32xf32>, vector<32x64xf32>, vector<16x64xf32> -> vector<16x64xf32>
    %141 = arith.addf %136, %140 : vector<16x64xf32>
    %142 = vector.extract_strided_slice %141 {offsets = [0, 0], sizes = [16, 32], strides = [1, 1]} : vector<16x64xf32> to vector<16x32xf32>
    %143 = vector.extract_strided_slice %141 {offsets = [0, 32], sizes = [16, 32], strides = [1, 1]} : vector<16x64xf32> to vector<16x32xf32>
    %144 = arith.negf %143 : vector<16x32xf32>
    %145 = math.exp %144 : vector<16x32xf32>
    %cst_64 = arith.constant 1.000000e+00 : f32
    %146 = vector.broadcast %cst_64 : f32 to vector<16x32xf32>
    %147 = arith.addf %146, %145 : vector<16x32xf32>
    %148 = arith.divf %146, %147 : vector<16x32xf32>
    %149 = arith.mulf %142, %148 : vector<16x32xf32>
    %150 = arith.addf %149, %124 : vector<16x32xf32>
    %cst_65 = arith.constant 0.707106769 : f32
    %151 = vector.broadcast %cst_65 : f32 to vector<16x32xf32>
    %152 = arith.mulf %150, %151 : vector<16x32xf32>
    %cst_66 = arith.constant dense<0.000000e+00> : vector<16x32xf32>
    %153 = tpu.matmul %152, %1, %cst_66 {dimension_numbers = #tpu.dot_dimension_numbers<[1], [0], [0], [1], [0, 0, 1, 1], [], []>} : vector<16x32xf32>, vector<32x32xf32>, vector<16x32xf32> -> vector<16x32xf32>
    %154 = vector.broadcast %7 : vector<1x32xf32> to vector<16x32xf32>
    %155 = arith.addf %153, %154 : vector<16x32xf32>
    %156 = arith.addf %155, %93 : vector<16x32xf32>
    %cst_67 = arith.constant 0.707106769 : f32
    %157 = vector.broadcast %cst_67 : f32 to vector<16x32xf32>
    %158 = arith.mulf %156, %157 : vector<16x32xf32>
    %cst_68 = arith.constant 0.000000e+00 : f32
    %159 = vector.broadcast %cst_68 : f32 to vector<112x32xf32>
    %160 = tpu.concatenate %155, %159 in 0 : vector<16x32xf32>, vector<112x32xf32> -> vector<128x32xf32>
    %161 = tpu.concatenate %158, %159 in 0 : vector<16x32xf32>, vector<112x32xf32> -> vector<128x32xf32>
    %c16 = arith.constant 16 : index
    %c0_69 = arith.constant 0 : index
    %162 = vector.load %arg0[%c16, %c0_69] : memref<32x32xf32, #tpu.memory_space<vmem>>, vector<16x32xf32>
    %cst_70 = arith.constant dense<0.000000e+00> : vector<16x32xf32>
    %163 = tpu.matmul %162, %2, %cst_70 {dimension_numbers = #tpu.dot_dimension_numbers<[1], [0], [0], [1], [0, 0, 1, 1], [], []>} : vector<16x32xf32>, vector<32x32xf32>, vector<16x32xf32> -> vector<16x32xf32>
    %164 = vector.broadcast %8 : vector<1x32xf32> to vector<16x32xf32>
    %165 = arith.addf %163, %164 : vector<16x32xf32>
    %cst_71 = arith.constant 0.000000e+00 : f32
    %166 = vector.broadcast %cst_71 : f32 to vector<16x64xf32>
    %c5 = arith.constant 5 : index
    %c0_72 = arith.constant 0 : index
    %167 = vector.load %arg3[%c5, %c0_72] : memref<10x128xf32, #tpu.memory_space<vmem>>, vector<1x64xf32>
    %168 = vector.broadcast %167 : vector<1x64xf32> to vector<16x64xf32>
    %169 = arith.addf %166, %168 : vector<16x64xf32>
    %c2_i32 = arith.constant 2 : i32
    %170 = tpu.dynamic_rotate %165 by %c2_i32 dim 0 : vector<16x32xf32>, i32 -> vector<16x32xf32>
    %171 = arith.mulf %170, %56 : vector<16x32xf32>
    %c192 = arith.constant 192 : index
    %c0_73 = arith.constant 0 : index
    %172 = vector.load %arg2[%c192, %c0_73] : memref<384x64xf32, #tpu.memory_space<vmem>>, vector<32x64xf32>
    %cst_74 = arith.constant dense<0.000000e+00> : vector<16x64xf32>
    %173 = tpu.matmul %171, %172, %cst_74 {dimension_numbers = #tpu.dot_dimension_numbers<[1], [0], [0], [1], [0, 0, 1, 1], [], []>} : vector<16x32xf32>, vector<32x64xf32>, vector<16x64xf32> -> vector<16x64xf32>
    %174 = arith.addf %169, %173 : vector<16x64xf32>
    %c1_i32_75 = arith.constant 1 : i32
    %175 = tpu.dynamic_rotate %165 by %c1_i32_75 dim 0 : vector<16x32xf32>, i32 -> vector<16x32xf32>
    %176 = arith.mulf %175, %67 : vector<16x32xf32>
    %c224 = arith.constant 224 : index
    %c0_76 = arith.constant 0 : index
    %177 = vector.load %arg2[%c224, %c0_76] : memref<384x64xf32, #tpu.memory_space<vmem>>, vector<32x64xf32>
    %cst_77 = arith.constant dense<0.000000e+00> : vector<16x64xf32>
    %178 = tpu.matmul %176, %177, %cst_77 {dimension_numbers = #tpu.dot_dimension_numbers<[1], [0], [0], [1], [0, 0, 1, 1], [], []>} : vector<16x32xf32>, vector<32x64xf32>, vector<16x64xf32> -> vector<16x64xf32>
    %179 = arith.addf %174, %178 : vector<16x64xf32>
    %c256 = arith.constant 256 : index
    %c0_78 = arith.constant 0 : index
    %180 = vector.load %arg2[%c256, %c0_78] : memref<384x64xf32, #tpu.memory_space<vmem>>, vector<32x64xf32>
    %cst_79 = arith.constant dense<0.000000e+00> : vector<16x64xf32>
    %181 = tpu.matmul %165, %180, %cst_79 {dimension_numbers = #tpu.dot_dimension_numbers<[1], [0], [0], [1], [0, 0, 1, 1], [], []>} : vector<16x32xf32>, vector<32x64xf32>, vector<16x64xf32> -> vector<16x64xf32>
    %182 = arith.addf %179, %181 : vector<16x64xf32>
    %183 = vector.extract_strided_slice %182 {offsets = [0, 0], sizes = [16, 32], strides = [1, 1]} : vector<16x64xf32> to vector<16x32xf32>
    %184 = vector.extract_strided_slice %182 {offsets = [0, 32], sizes = [16, 32], strides = [1, 1]} : vector<16x64xf32> to vector<16x32xf32>
    %185 = arith.negf %184 : vector<16x32xf32>
    %186 = math.exp %185 : vector<16x32xf32>
    %cst_80 = arith.constant 1.000000e+00 : f32
    %187 = vector.broadcast %cst_80 : f32 to vector<16x32xf32>
    %188 = arith.addf %187, %186 : vector<16x32xf32>
    %189 = arith.divf %187, %188 : vector<16x32xf32>
    %190 = arith.mulf %183, %189 : vector<16x32xf32>
    %cst_81 = arith.constant dense<0.000000e+00> : vector<16x32xf32>
    %191 = tpu.matmul %190, %3, %cst_81 {dimension_numbers = #tpu.dot_dimension_numbers<[1], [0], [0], [1], [0, 0, 1, 1], [], []>} : vector<16x32xf32>, vector<32x32xf32>, vector<16x32xf32> -> vector<16x32xf32>
    %192 = vector.broadcast %9 : vector<1x32xf32> to vector<16x32xf32>
    %193 = arith.addf %191, %192 : vector<16x32xf32>
    %194 = arith.addf %193, %162 : vector<16x32xf32>
    %cst_82 = arith.constant 0.707106769 : f32
    %195 = vector.broadcast %cst_82 : f32 to vector<16x32xf32>
    %196 = arith.mulf %194, %195 : vector<16x32xf32>
    %cst_83 = arith.constant dense<0.000000e+00> : vector<16x128xf32>
    %197 = tpu.matmul %196, %160, %cst_83 {dimension_numbers = #tpu.dot_dimension_numbers<[1], [1], [0], [0], [0, 0, 1, 0], [], []>} : vector<16x32xf32>, vector<128x32xf32>, vector<16x128xf32> -> vector<16x128xf32>
    %cst_84 = arith.constant -1.000000e+30 : f32
    %198 = vector.broadcast %cst_84 : f32 to vector<16x128xf32>
    %199 = arith.select %92, %197, %198 : vector<16x128xi1>, vector<16x128xf32>
    %cst_85 = arith.constant dense<0xFF800000> : vector<16xf32>
    %200 = vector.multi_reduction <maximumf>, %199, %cst_85 [1] : vector<16x128xf32> to vector<16xf32>
    %201 = vector.shape_cast %200 : vector<16xf32> to vector<16x1xf32>
    %202 = vector.broadcast %201 : vector<16x1xf32> to vector<16x128xf32>
    %203 = arith.subf %199, %202 : vector<16x128xf32>
    %204 = math.exp %203 : vector<16x128xf32>
    %cst_86 = arith.constant dense<0.000000e+00> : vector<16xf32>
    %205 = vector.multi_reduction <add>, %204, %cst_86 [1] : vector<16x128xf32> to vector<16xf32>
    %206 = vector.shape_cast %205 : vector<16xf32> to vector<16x1xf32>
    %207 = tpu.reciprocal %206 {approx = true} : vector<16x1xf32> -> vector<16x1xf32>
    %208 = vector.broadcast %207 : vector<16x1xf32> to vector<16x128xf32>
    %209 = arith.mulf %204, %208 : vector<16x128xf32>
    %cst_87 = arith.constant dense<0.000000e+00> : vector<16x32xf32>
    %210 = tpu.matmul %209, %161, %cst_87 {dimension_numbers = #tpu.dot_dimension_numbers<[1], [0], [0], [1], [0, 0, 1, 1], [], []>} : vector<16x128xf32>, vector<128x32xf32>, vector<16x32xf32> -> vector<16x32xf32>
    %cst_88 = arith.constant dense<0.000000e+00> : vector<16x32xf32>
    %211 = tpu.matmul %210, %4, %cst_88 {dimension_numbers = #tpu.dot_dimension_numbers<[1], [0], [0], [1], [0, 0, 1, 1], [], []>} : vector<16x32xf32>, vector<32x32xf32>, vector<16x32xf32> -> vector<16x32xf32>
    %212 = vector.broadcast %10 : vector<1x32xf32> to vector<16x32xf32>
    %213 = arith.addf %211, %212 : vector<16x32xf32>
    %214 = arith.addf %190, %213 : vector<16x32xf32>
    %cst_89 = arith.constant 0.707106769 : f32
    %215 = vector.broadcast %cst_89 : f32 to vector<16x32xf32>
    %216 = arith.mulf %214, %215 : vector<16x32xf32>
    %217 = arith.addf %216, %165 : vector<16x32xf32>
    %cst_90 = arith.constant 0.707106769 : f32
    %218 = vector.broadcast %cst_90 : f32 to vector<16x32xf32>
    %219 = arith.mulf %217, %218 : vector<16x32xf32>
    %cst_91 = arith.constant 0.000000e+00 : f32
    %220 = vector.broadcast %cst_91 : f32 to vector<16x64xf32>
    %c6 = arith.constant 6 : index
    %c0_92 = arith.constant 0 : index
    %221 = vector.load %arg3[%c6, %c0_92] : memref<10x128xf32, #tpu.memory_space<vmem>>, vector<1x64xf32>
    %222 = vector.broadcast %221 : vector<1x64xf32> to vector<16x64xf32>
    %223 = arith.addf %220, %222 : vector<16x64xf32>
    %c2_i32_93 = arith.constant 2 : i32
    %224 = tpu.dynamic_rotate %219 by %c2_i32_93 dim 0 : vector<16x32xf32>, i32 -> vector<16x32xf32>
    %225 = arith.mulf %224, %56 : vector<16x32xf32>
    %c288 = arith.constant 288 : index
    %c0_94 = arith.constant 0 : index
    %226 = vector.load %arg2[%c288, %c0_94] : memref<384x64xf32, #tpu.memory_space<vmem>>, vector<32x64xf32>
    %cst_95 = arith.constant dense<0.000000e+00> : vector<16x64xf32>
    %227 = tpu.matmul %225, %226, %cst_95 {dimension_numbers = #tpu.dot_dimension_numbers<[1], [0], [0], [1], [0, 0, 1, 1], [], []>} : vector<16x32xf32>, vector<32x64xf32>, vector<16x64xf32> -> vector<16x64xf32>
    %228 = arith.addf %223, %227 : vector<16x64xf32>
    %c1_i32_96 = arith.constant 1 : i32
    %229 = tpu.dynamic_rotate %219 by %c1_i32_96 dim 0 : vector<16x32xf32>, i32 -> vector<16x32xf32>
    %230 = arith.mulf %229, %67 : vector<16x32xf32>
    %c320 = arith.constant 320 : index
    %c0_97 = arith.constant 0 : index
    %231 = vector.load %arg2[%c320, %c0_97] : memref<384x64xf32, #tpu.memory_space<vmem>>, vector<32x64xf32>
    %cst_98 = arith.constant dense<0.000000e+00> : vector<16x64xf32>
    %232 = tpu.matmul %230, %231, %cst_98 {dimension_numbers = #tpu.dot_dimension_numbers<[1], [0], [0], [1], [0, 0, 1, 1], [], []>} : vector<16x32xf32>, vector<32x64xf32>, vector<16x64xf32> -> vector<16x64xf32>
    %233 = arith.addf %228, %232 : vector<16x64xf32>
    %c352 = arith.constant 352 : index
    %c0_99 = arith.constant 0 : index
    %234 = vector.load %arg2[%c352, %c0_99] : memref<384x64xf32, #tpu.memory_space<vmem>>, vector<32x64xf32>
    %cst_100 = arith.constant dense<0.000000e+00> : vector<16x64xf32>
    %235 = tpu.matmul %219, %234, %cst_100 {dimension_numbers = #tpu.dot_dimension_numbers<[1], [0], [0], [1], [0, 0, 1, 1], [], []>} : vector<16x32xf32>, vector<32x64xf32>, vector<16x64xf32> -> vector<16x64xf32>
    %236 = arith.addf %233, %235 : vector<16x64xf32>
    %237 = vector.extract_strided_slice %236 {offsets = [0, 0], sizes = [16, 32], strides = [1, 1]} : vector<16x64xf32> to vector<16x32xf32>
    %238 = vector.extract_strided_slice %236 {offsets = [0, 32], sizes = [16, 32], strides = [1, 1]} : vector<16x64xf32> to vector<16x32xf32>
    %239 = arith.negf %238 : vector<16x32xf32>
    %240 = math.exp %239 : vector<16x32xf32>
    %cst_101 = arith.constant 1.000000e+00 : f32
    %241 = vector.broadcast %cst_101 : f32 to vector<16x32xf32>
    %242 = arith.addf %241, %240 : vector<16x32xf32>
    %243 = arith.divf %241, %242 : vector<16x32xf32>
    %244 = arith.mulf %237, %243 : vector<16x32xf32>
    %cst_102 = arith.constant dense<0.000000e+00> : vector<16x32xf32>
    %245 = tpu.matmul %244, %3, %cst_102 {dimension_numbers = #tpu.dot_dimension_numbers<[1], [0], [0], [1], [0, 0, 1, 1], [], []>} : vector<16x32xf32>, vector<32x32xf32>, vector<16x32xf32> -> vector<16x32xf32>
    %246 = vector.broadcast %9 : vector<1x32xf32> to vector<16x32xf32>
    %247 = arith.addf %245, %246 : vector<16x32xf32>
    %248 = arith.addf %247, %162 : vector<16x32xf32>
    %cst_103 = arith.constant 0.707106769 : f32
    %249 = vector.broadcast %cst_103 : f32 to vector<16x32xf32>
    %250 = arith.mulf %248, %249 : vector<16x32xf32>
    %cst_104 = arith.constant dense<0.000000e+00> : vector<16x128xf32>
    %251 = tpu.matmul %250, %160, %cst_104 {dimension_numbers = #tpu.dot_dimension_numbers<[1], [1], [0], [0], [0, 0, 1, 0], [], []>} : vector<16x32xf32>, vector<128x32xf32>, vector<16x128xf32> -> vector<16x128xf32>
    %cst_105 = arith.constant -1.000000e+30 : f32
    %252 = vector.broadcast %cst_105 : f32 to vector<16x128xf32>
    %253 = arith.select %92, %251, %252 : vector<16x128xi1>, vector<16x128xf32>
    %cst_106 = arith.constant dense<0xFF800000> : vector<16xf32>
    %254 = vector.multi_reduction <maximumf>, %253, %cst_106 [1] : vector<16x128xf32> to vector<16xf32>
    %255 = vector.shape_cast %254 : vector<16xf32> to vector<16x1xf32>
    %256 = vector.broadcast %255 : vector<16x1xf32> to vector<16x128xf32>
    %257 = arith.subf %253, %256 : vector<16x128xf32>
    %258 = math.exp %257 : vector<16x128xf32>
    %cst_107 = arith.constant dense<0.000000e+00> : vector<16xf32>
    %259 = vector.multi_reduction <add>, %258, %cst_107 [1] : vector<16x128xf32> to vector<16xf32>
    %260 = vector.shape_cast %259 : vector<16xf32> to vector<16x1xf32>
    %261 = tpu.reciprocal %260 {approx = true} : vector<16x1xf32> -> vector<16x1xf32>
    %262 = vector.broadcast %261 : vector<16x1xf32> to vector<16x128xf32>
    %263 = arith.mulf %258, %262 : vector<16x128xf32>
    %cst_108 = arith.constant dense<0.000000e+00> : vector<16x32xf32>
    %264 = tpu.matmul %263, %161, %cst_108 {dimension_numbers = #tpu.dot_dimension_numbers<[1], [0], [0], [1], [0, 0, 1, 1], [], []>} : vector<16x128xf32>, vector<128x32xf32>, vector<16x32xf32> -> vector<16x32xf32>
    %cst_109 = arith.constant dense<0.000000e+00> : vector<16x32xf32>
    %265 = tpu.matmul %264, %4, %cst_109 {dimension_numbers = #tpu.dot_dimension_numbers<[1], [0], [0], [1], [0, 0, 1, 1], [], []>} : vector<16x32xf32>, vector<32x32xf32>, vector<16x32xf32> -> vector<16x32xf32>
    %266 = vector.broadcast %10 : vector<1x32xf32> to vector<16x32xf32>
    %267 = arith.addf %265, %266 : vector<16x32xf32>
    %268 = arith.addf %244, %267 : vector<16x32xf32>
    %cst_110 = arith.constant 0.707106769 : f32
    %269 = vector.broadcast %cst_110 : f32 to vector<16x32xf32>
    %270 = arith.mulf %268, %269 : vector<16x32xf32>
    %271 = arith.addf %270, %219 : vector<16x32xf32>
    %cst_111 = arith.constant 0.707106769 : f32
    %272 = vector.broadcast %cst_111 : f32 to vector<16x32xf32>
    %273 = arith.mulf %271, %272 : vector<16x32xf32>
    %cst_112 = arith.constant dense<0.000000e+00> : vector<16x128xf32>
    %274 = tpu.matmul %273, %5, %cst_112 {dimension_numbers = #tpu.dot_dimension_numbers<[1], [0], [0], [1], [0, 0, 1, 1], [], []>} : vector<16x32xf32>, vector<32x128xf32>, vector<16x128xf32> -> vector<16x128xf32>
    %275 = vector.broadcast %11 : vector<1x128xf32> to vector<16x128xf32>
    %276 = arith.addf %274, %275 : vector<16x128xf32>
    %c0_113 = arith.constant 0 : index
    %c0_114 = arith.constant 0 : index
    %277 = vector.load %arg4[%c0_113, %c0_114] : memref<16x128xf32, #tpu.memory_space<vmem>>, vector<16x128xf32>
    tpu.vector_store %arg4[%c0_113, %c0_114], %276 {strides = array<i32>} : memref<16x128xf32, #tpu.memory_space<vmem>>, vector<16x128xf32>,
    %c0_115 = arith.constant 0 : index
    %c0_116 = arith.constant 0 : index
    %278 = vector.load %arg5[%c0_115, %c0_116] : memref<16x128xf32, #tpu.memory_space<vmem>>, vector<16x128xf32>
    tpu.vector_store %arg5[%c0_115, %c0_116], %263 {strides = array<i32>} : memref<16x128xf32, #tpu.memory_space<vmem>>, vector<16x128xf32>,
    return
  }
}

</mosaic_0001>

<bundles_post_ra>
// kernel: seq2seq_forward.1
= control target key start
LH: loop header
LB: loop body
LE: loop exit
PB: predicated region body
PF: predicated region fallthrough
CT: control target
= control target key end

     0   :  { %vm126_vm0 = vcmask 261120   ;;  %s3754_s0 = inlined_call_operand.vmem [shape: f32[32,32], index: 0, kind: input, shape index: {}]   ;;  %s3755_s1 = inlined_call_operand.vmem [shape: f32[192,128], index: 1, kind: input, shape index: {}]   ;;  %s3756_s2 = inlined_call_operand.vmem [shape: f32[384,64], index: 2, kind: input, shape index: {}]   ;;  %s3757_s3 = inlined_call_operand.vmem [shape: f32[10,128], index: 3, kind: input, shape index: {}]   ;;  %s3758_s4 = inlined_call_operand.vmem [shape: f32[16,128], index: 4, kind: output, shape index: {0}]   ;;  %s3759_s5 = inlined_call_operand.hbm [shape: f32[16,128], index: 5, kind: output, shape index: {1}]  }
   0x1   :  { %v20_v0 = vld [vmem:[%s3755_s1] sm:$0xff]  ;;  %v21_v1 = vld [vmem:[%s3755_s1 + $0x8] sm:$0xff]  ;;  %v22_v2 = vld [vmem:[%s3755_s1 + $0x10] sm:$0xff] }
   0x2   :  { %v2882_v3 = vpack.c.bf16 %v21_v1, %v20_v0  ;;  %v23_v4 = vld [vmem:[%s3755_s1 + $0x18] sm:$0xff]  ;;  %v3213_v5 = vld [vmem:[%s3754_s0] sm:$0xff] }
   0x3   :  { %v2886_v6 = vpack.c.bf16 %v23_v4, %v22_v2  ;;  %2642 = vmatprep.mubr.msk.f32.mxu0 %vm126_vm0, %v3213_v5 }
   0x4   :  { %11 = vsyncpa [#allocation3], 0  ;;  %2883 = vmatprep.subr.bf16.mxu0 %v2882_v3  ;;  %v3220_v7 = vld [vmem:[%s3754_s0 + $0x8] sm:$0xff]  ;;  %v221_v8 = vld [vmem:[%s3756_s2] sm:$0xff]  ;;  %v50_v17 = vlaneseq  ;;  %v3163_v26 = vmov 0.0   ;;  %s3164_s16 = smov 96  }
   0x5   :  { %2885 = vmatpush3.bf16.msra.mxu0 %v2882_v3  ;;  %v222_v9 = vld [vmem:[%s3756_s2 + $0x8] sm:$0xff]  ;;  %v223_v11 = vld [vmem:[%s3756_s2 + $0x10] sm:$0xff]  ;;  %v224_v12 = vld [vmem:[%s3756_s2 + $0x18] sm:$0xff] }
   0x6   :  { %2887 = vmatprep.subr.bf16.mxu0 %v2886_v6  ;;  %v2890_v10 = vpack.c.bf16 %v222_v9, %v221_v8  ;;  %v2894_v13 = vpack.c.bf16 %v224_v12, %v223_v11  ;;  %v308_v14 = vld [vmem:[%s3756_s2 + $0x20] sm:$0xff]  ;;  %v309_v15 = vld [vmem:[%s3756_s2 + $0x28] sm:$0xff]  ;;  %v3243_v18 = vshrl.u32 %v50_v17, 7  ;;  %v310_v29 = vld [vmem:[%s3756_s2 + $0x30] sm:$0xff] }
   0x7   :  { %v2898_v16 = vpack.c.bf16 %v309_v15, %v308_v14  ;;  %v2432_v20 = vld [vmem:[%s3757_s3] ss:$0 sm:$0xff]  ;;  %v311_v30 = vld [vmem:[%s3756_s2 + $0x38] sm:$0xff]  ;;  %v403_v38 = vld [vmem:[%s3756_s2 + $0x48] sm:$0xff] }
   0x8   :  { %2891 = vmatprep.subr.bf16.mxu1 %v2890_v10  ;;  %v58_v19 = vadd.s32 4294967295, %v3243_v18  ;;  %vm216_vm2 = vcmp.lt.s32.totalorder %v3243_v18, 1  ;;  %v70_v35 = vadd.s32 1, %v3243_v18  ;;  %v2902_v36 = vpack.c.bf16 %v311_v30, %v310_v29  ;;  %v402_v37 = vld [vmem:[%s3756_s2 + $0x40] sm:$0xff]  ;;  %v404_v42 = vld [vmem:[%s3756_s2 + $0x50] sm:$0xff]  ;;  %v405_v43 = vld [vmem:[%s3756_s2 + $0x58] sm:$0xff] }
   0x9   :  { %2889 = vmatpush3.bf16.msra.mxu0 %v2886_v6  ;;  %2893 = vmatpush3.bf16.msra.mxu1 %v2890_v10  ;;  %vm397_vm4 = vcmp.lt.s32.totalorder %v3243_v18, 7  ;;  %v2906_v41 = vpack.c.bf16 %v403_v38, %v402_v37  ;;  %v2910_v46 = vpack.c.bf16 %v405_v43, %v404_v42  ;;  %v2435_v50 = vld [vmem:[%s3757_s3 + $0x1] ss:$0 sm:$0xff]  ;;  %v528_v62 = vld [vmem:[%s3756_s2 + $0x68] sm:$0xff]  ;;  %v529_v0 = vld [vmem:[%s3756_s2 + $0x70] sm:$0xff]  ;;  %vm1004_vm6 = vcmp.lt.s32.totalorder %v3243_v18, 2 }
   0xa   :  { %2895 = vmatprep.subr.bf16.mxu1 %v2894_v13  ;;  %vm60_vm1 = vcmp.ge.s32.totalorder %v58_v19, 0  ;;  %vm74_vm3 = vcmp.lt.s32.totalorder %v70_v35, 8  ;;  %v527_v61 = vld [vmem:[%s3756_s2 + $0x60] sm:$0xff]  ;;  %v530_v1 = vld [vmem:[%s3756_s2 + $0x78] sm:$0xff]  ;;  %v615_v6 = vld [vmem:[%s3756_s2 + $0x88] sm:$0xff] }
   0xb   :  { %v3256_v27 = vsel %vm60_vm1, 1.0, %v3163_v26  ;;  %v3292_v44 = vsel %vm74_vm3, 1.0, %v3163_v26  ;;  %v2914_v63 = vpack.c.bf16 %v528_v62, %v527_v61  ;;  %v2918_v2 = vpack.c.bf16 %v530_v1, %v529_v0  ;;  %v614_v4 = vld [vmem:[%s3756_s2 + $0x80] sm:$0xff]  ;;  %v710_v37 = vld [vmem:[%s3756_s2 + $0xb8] sm:$0xff]  ;;  %v29_v42 = vld [vmem:[%s3755_s1 + $0x48] sm:$0xff] }
   0xc   :  { %2643 = vmatmul.mubr.msk.f32.vlgmr.msra.gmra.mrb[0].mxu0 %vm126_vm0, %v3220_v7  ;;  %v2922_v8 = vpack.c.bf16 %v615_v6, %v614_v4  ;;  %v26_v1 = vld [vmem:[%s3755_s1 + $0x30] sm:$0xff]  ;;  %v1009_v6 = vld [vmem:[%s3756_s2 + $0xc0] sm:$0xff]  ;;  %vm3520_vm7 = vmpackc.low %vm126_vm0, %vm126_vm0 }
   0xd   :  { %2897 = vmatpush3.bf16.msra.mxu1 %v2894_v13  ;;  %2915 = vmatprep.subr.bf16.mxu0 %v2914_v63 }
   0xe   :  { %2899 = vmatprep.subr.bf16.mxu1 %v2898_v16  ;;  %2917 = vmatpush3.bf16.msra.mxu0 %v2914_v63 }
   0xf   :  { %2919 = vmatprep.subr.bf16.mxu0 %v2918_v2 }
  0x12   :  { %2921 = vmatpush3.bf16.msra.mxu0 %v2918_v2  ;;  %v27_v2 = vld [vmem:[%s3755_s1 + $0x38] sm:$0xff] }
  0x13   :  { %2923 = vmatprep.subr.bf16.mxu0 %v2922_v8 }
  0xdf   :  { %v2644_v21 = vpop.f32.mrb[0].mxu0 }
  0xe0   :  { %v3249_v22 = vadd.f32 %v2644_v21, %v2432_v20  ;;  %v199_v23 = vpop.f32.mrb[1].mxu0 }
  0xe1   :  { %v3251_v24 = vadd.f32 %v2432_v20, %v199_v23  ;;  %v616_v23 = vld [vmem:[%s3756_s2 + $0x90] sm:$0xff] }
  0xe2   :  { %v215_v25 = vrot.slane %v3249_v22, 7  ;;  %v396_v39 = vrot.slane %v3249_v22, 1 }
  0xe3   :  { %v214_v28 = vrot.slane %v3251_v24, 7  ;;  %v395_v40 = vrot.slane %v3251_v24, 1 }
  0xe5   :  { %v218_v31 = vsel %vm216_vm2, %v215_v25, %v214_v28  ;;  %v217_v32 = vsel %vm216_vm2, %v214_v28, %v215_v25  ;;  %v398_v45 = vsel %vm397_vm4, %v395_v40, %v396_v39  ;;  %v399_v48 = vsel %vm397_vm4, %v396_v39, %v395_v40 }
  0xe6   :  { %v219_v33 = vmul.f32 %v3256_v27, %v218_v31  ;;  %v220_v34 = vmul.f32 %v3256_v27, %v217_v32  ;;  %v400_v47 = vmul.f32 %v3292_v44, %v398_v45  ;;  %v401_v49 = vmul.f32 %v3292_v44, %v399_v48  ;;  %v707_v31 = vld [vmem:[%s3756_s2 + $0xa0] sm:$0xff]  ;;  %v708_v32 = vld [vmem:[%s3756_s2 + $0xa8] sm:$0xff] }
  0xe7   :  { %v2930_v35 = vpack.c.bf16 %v708_v32, %v707_v31 }
  0xe8   :  { %2653 = vmatprep.mubr.msk.f32.mxu1 %vm126_vm0, %v219_v33 }
  0xe9   :  { %2654 = vmatmul.mubr.msk.f32.vlgmr.msra.gmra.mrb[0].mxu1 %vm126_vm0, %v220_v34 }
  0xea   :  { %2901 = vmatpush3.bf16.msra.mxu1 %v2898_v16  ;;  %2664 = vmatprep.mubr.msk.f32.mxu1 %vm126_vm0, %v3251_v24 }
  0xeb   :  { %2903 = vmatprep.subr.bf16.mxu1 %v2902_v36 }
  0xee   :  { %2905 = vmatpush3.bf16.msra.mxu1 %v2902_v36  ;;  %v709_v36 = vld [vmem:[%s3756_s2 + $0xb0] sm:$0xff] }
  0xef   :  { %2907 = vmatprep.subr.bf16.mxu1 %v2906_v41  ;;  %v2934_v39 = vpack.c.bf16 %v710_v37, %v709_v36  ;;  %v1102_v37 = vld [vmem:[%s3756_s2 + $0xe0] sm:$0xff] }
  0xf1   :  { %2665 = vmatmul.mubr.msk.f32.vlgmr.msra.gmra.mrb[0].mxu1 %vm126_vm0, %v3249_v22 }
  0xf2   :  { %2909 = vmatpush3.bf16.msra.mxu1 %v2906_v41  ;;  %2675 = vmatprep.mubr.msk.f32.mxu1 %vm126_vm0, %v400_v47  ;;  %v28_v41 = vld [vmem:[%s3755_s1 + $0x40] sm:$0xff]  ;;  %v31_v47 = vld [vmem:[%s3755_s1 + $0x58] sm:$0xff] }
  0xf3   :  { %2911 = vmatprep.subr.bf16.mxu1 %v2910_v46  ;;  %v2946_v43 = vpack.c.bf16 %v29_v42, %v28_v41  ;;  %v1104_v42 = vld [vmem:[%s3756_s2 + $0xf0] sm:$0xff] }
  0xf6   :  { %2913 = vmatpush3.bf16.msra.mxu1 %v2910_v46  ;;  %v30_v46 = vld [vmem:[%s3755_s1 + $0x50] sm:$0xff] }
  0xf9   :  { %2676 = vmatmul.mubr.msk.f32.vlgmr.msra.gmra.mrb[0].mxu1 %vm126_vm0, %v401_v49  ;;  %v2950_v49 = vpack.c.bf16 %v31_v47, %v30_v46 }
 0x1cc   :  { %v2677_v51 = vpop.f32.mrb[0].mxu1 }
 0x1cd   :  { %v3062_v52 = vadd.f32 %v2677_v51, %v2435_v50  ;;  %v478_v53 = vpop.f32.mrb[1].mxu1  ;;  %v3397_v51 = vld [vmem:[%s3754_s0 + $0x18] sm:$0xff] }
 0x1ce   :  { %v3063_v54 = vadd.f32 %v2435_v50, %v478_v53  ;;  %v3389_v50 = vld [vmem:[%s3754_s0 + $0x10] sm:$0xff] }
 0x1cf   :  { %v2443_v55 = vmul.f32 -1.442695, %v3062_v52 }
 0x1d0   :  { %v2442_v56 = vmul.f32 -1.442695, %v3063_v54 }
 0x1d1   :  { %3091 = vpow2.f32 %v2443_v55 }
 0x1d2   :  { %3093 = vpow2.f32 %v2442_v56 }
 0x1db   :  { %v3092_v57 = vpop.eup %3091 }
 0x1dc   :  { %v3094_v58 = vpop.eup %3093  ;;  %v496_v60 = vadd.f32 1.0, %v3092_v57 }
 0x1dd   :  { %v495_v59 = vadd.f32 1.0, %v3094_v58 }
 0x1df   :  { %3095 = vrcp.f32 %v495_v59  ;;  %v24_v59 = vld [vmem:[%s3755_s1 + $0x20] sm:$0xff] }
 0x1e0   :  { %3097 = vrcp.f32 %v496_v60  ;;  %v25_v60 = vld [vmem:[%s3755_s1 + $0x28] sm:$0xff] }
 0x1e1   :  { %v2938_v62 = vpack.c.bf16 %v25_v60, %v24_v59  ;;  %v33_v59 = vld [vmem:[%s3755_s1 + $0x68] sm:$0xff] }
 0x1e3   :  { %2939 = vmatprep.subr.bf16.mxu1 %v2938_v62 }
 0x1e4   :  { %2941 = vmatpush3.bf16.msra.mxu1 %v2938_v62  ;;  %v35_v62 = vld [vmem:[%s3755_s1 + $0x78] sm:$0xff] }
 0x1e9   :  { %v3096_v3 = vpop.eup %3095 }
 0x1ea   :  { %503 = vrot.lane.b32.xlu0 %v3096_v3, %s3164_s16  ;;  %v3098_v9 = vpop.eup %3097  ;;  %v2942_v3 = vpack.c.bf16 %v27_v2, %v26_v1 }
 0x1ec   :  { %2943 = vmatprep.subr.bf16.mxu1 %v2942_v3 }
 0x1ed   :  { %2945 = vmatpush3.bf16.msra.mxu1 %v2942_v3 }
 0x1ee   :  { %505 = vrot.lane.b32.xlu0 %v3098_v9, %s3164_s16 }
 0x25c   :  { %v504_v10 = vpop.permute.xlu0 %503 }
 0x25d   :  { %v509_v11 = vmul.f32 %v3063_v54, %v504_v10 }
 0x25f   :  { %v511_v12 = vadd.f32 %v509_v11, %v3251_v24  ;;  %v617_v24 = vld [vmem:[%s3756_s2 + $0x98] sm:$0xff] }
 0x260   :  { %v506_v13 = vpop.permute.xlu0 %505  ;;  %v2926_v30 = vpack.c.bf16 %v617_v24, %v616_v23 }
 0x261   :  { %v510_v14 = vmul.f32 %v3062_v52, %v506_v13  ;;  %v3328_v15 = vmul.f32 0.70710677, %v511_v12  ;;  %v2456_v13 = vld [vmem:[%s3757_s3 + $0x4] ss:$0 sm:$0xff] }
 0x263   :  { %v512_v16 = vadd.f32 %v510_v14, %v3249_v22  ;;  %v521_v20 = vrot.slane %v3328_v15, 7  ;;  %v701_v34 = vrot.slane %v3328_v15, 1 }
 0x265   :  { %v3331_v19 = vmul.f32 0.70710677, %v512_v16 }
 0x267   :  { %v522_v21 = vrot.slane %v3331_v19, 7  ;;  %v702_v33 = vrot.slane %v3331_v19, 1 }
 0x269   :  { %v524_v25 = vsel %vm216_vm2, %v522_v21, %v521_v20  ;;  %v523_v22 = vsel %vm216_vm2, %v521_v20, %v522_v21  ;;  %v703_v38 = vsel %vm397_vm4, %v701_v34, %v702_v33  ;;  %v704_v45 = vsel %vm397_vm4, %v702_v33, %v701_v34  ;;  %v1011_v33 = vld [vmem:[%s3756_s2 + $0xd0] sm:$0xff]  ;;  %v1012_v34 = vld [vmem:[%s3756_s2 + $0xd8] sm:$0xff] }
 0x26a   :  { %v525_v28 = vmul.f32 %v3256_v27, %v524_v25  ;;  %v526_v29 = vmul.f32 %v3256_v27, %v523_v22  ;;  %v705_v40 = vmul.f32 %v3292_v44, %v703_v38  ;;  %v706_v48 = vmul.f32 %v3292_v44, %v704_v45  ;;  %v2444_v44 = vld [vmem:[%s3757_s3 + $0x2] ss:$0 sm:$0xff]  ;;  %v1103_v38 = vld [vmem:[%s3756_s2 + $0xe8] sm:$0xff] }
 0x26b   :  { %v82_v20 = vadd.s32 4294967294, %v3243_v18  ;;  %v2478_v18 = vld [vmem:[%s3757_s3 + $0x6] ss:$0 sm:$0xff] }
 0x26c   :  { %2686 = vmatprep.mubr.msk.f32.mxu0 %vm126_vm0, %v525_v28 }
 0x26d   :  { %2687 = vmatmul.mubr.msk.f32.vlgmr.msra.gmra.mrb[2].mxu0 %vm126_vm0, %v526_v29  ;;  %vm84_vm5 = vcmp.ge.s32.totalorder %v82_v20, 0 }
 0x26e   :  { %2925 = vmatpush3.bf16.msra.mxu0 %v2922_v8  ;;  %2697 = vmatprep.mubr.msk.f32.mxu0 %vm126_vm0, %v3328_v15  ;;  %v1010_v8 = vld [vmem:[%s3756_s2 + $0xc8] sm:$0xff]  ;;  %v3437_v31 = vsel %vm84_vm5, 1.0, %v3163_v26  ;;  %v2958_v26 = vpack.c.bf16 %v1012_v34, %v1011_v33 }
 0x26f   :  { %2927 = vmatprep.subr.bf16.mxu0 %v2926_v30  ;;  %v2954_v10 = vpack.c.bf16 %v1010_v8, %v1009_v6 }
 0x271   :  { %2955 = vmatprep.subr.bf16.mxu1 %v2954_v10 }
 0x272   :  { %2929 = vmatpush3.bf16.msra.mxu0 %v2926_v30 }
 0x273   :  { %2931 = vmatprep.subr.bf16.mxu0 %v2930_v35 }
 0x275   :  { %2698 = vmatmul.mubr.msk.f32.vlgmr.msra.gmra.mrb[2].mxu0 %vm126_vm0, %v3331_v19 }
 0x276   :  { %2933 = vmatpush3.bf16.msra.mxu0 %v2930_v35  ;;  %2708 = vmatprep.mubr.msk.f32.mxu0 %vm126_vm0, %v705_v40 }
 0x277   :  { %2935 = vmatprep.subr.bf16.mxu0 %v2934_v39 }
 0x27a   :  { %2937 = vmatpush3.bf16.msra.mxu0 %v2934_v39 }
 0x27b   :  { %2947 = vmatprep.subr.bf16.mxu0 %v2946_v43 }
 0x27d   :  { %2709 = vmatmul.mubr.msk.f32.vlgmr.msra.gmra.mrb[2].mxu0 %vm126_vm0, %v706_v48 }
 0x27e   :  { %2949 = vmatpush3.bf16.msra.mxu0 %v2946_v43  ;;  %2730 = vmatprep.mubr.msk.f32.mxu0 %vm126_vm0, %v3389_v50  ;;  %v1105_v43 = vld [vmem:[%s3756_s2 + $0xf8] sm:$0xff] }
 0x27f   :  { %2951 = vmatprep.subr.bf16.mxu0 %v2950_v49  ;;  %v2966_v47 = vpack.c.bf16 %v1105_v43, %v1104_v42 }
 0x282   :  { %2953 = vmatpush3.bf16.msra.mxu0 %v2950_v49  ;;  %v1189_v49 = vld [vmem:[%s3756_s2 + $0x100] sm:$0xff] }
 0x285   :  { %2731 = vmatmul.mubr.msk.f32.vlgmr.msra.gmra.mrb[4].mxu0 %vm126_vm0, %v3397_v51 }
 0x350   :  { %v2710_v52 = vpop.f32.mrb[2].mxu0 }
 0x351   :  { %v3064_v53 = vadd.f32 %v2710_v52, %v2444_v44  ;;  %v783_v54 = vpop.f32.mrb[3].mxu0 }
 0x352   :  { %v3065_v55 = vadd.f32 %v2444_v44, %v783_v54  ;;  %v1190_v44 = vld [vmem:[%s3756_s2 + $0x108] sm:$0xff]  ;;  %v1191_v54 = vld [vmem:[%s3756_s2 + $0x110] sm:$0xff] }
 0x353   :  { %v2452_v56 = vmul.f32 -1.442695, %v3064_v53  ;;  %v2970_v52 = vpack.c.bf16 %v1190_v44, %v1189_v49 }
 0x354   :  { %v2451_v57 = vmul.f32 -1.442695, %v3065_v55 }
 0x355   :  { %3099 = vpow2.f32 %v2452_v56 }
 0x356   :  { %3101 = vpow2.f32 %v2451_v57 }
 0x358   :  { %v2732_v4 = vpop.f32.mrb[4].mxu0 }
 0x359   :  { %v987_v9 = vpop.f32.mrb[5].mxu0  ;;  %v3427_v14 = vadd.f32 %v2732_v4, %v2456_v13 }
 0x35a   :  { %v3429_v16 = vadd.f32 %v2456_v13, %v987_v9 }
 0x35b   :  { %v1003_v24 = vrot.slane %v3427_v14, 6  ;;  %v1097_v39 = vrot.slane %v3427_v14, 7 }
 0x35c   :  { %v1002_v25 = vrot.slane %v3429_v16, 6  ;;  %v1096_v40 = vrot.slane %v3429_v16, 7 }
 0x35e   :  { %v1006_v32 = vsel %vm1004_vm6, %v1003_v24, %v1002_v25  ;;  %v1005_v41 = vsel %vm1004_vm6, %v1002_v25, %v1003_v24  ;;  %v1099_v45 = vsel %vm216_vm2, %v1097_v39, %v1096_v40 }
 0x35f   :  { %v3100_v58 = vpop.eup %3099  ;;  %v1008_v46 = vmul.f32 %v3437_v31, %v1005_v41  ;;  %v1100_v48 = vmul.f32 %v3256_v27, %v1099_v45  ;;  %v3562_v45 = vand.u32 127, %v50_v17 }
 0x360   :  { %v3102_v61 = vpop.eup %3101  ;;  %v801_v0 = vadd.f32 1.0, %v3100_v58  ;;  %v32_v58 = vld [vmem:[%s3755_s1 + $0x60] sm:$0xff] }
 0x361   :  { %v800_v63 = vadd.f32 1.0, %v3102_v61  ;;  %v3500_v60 = vpack.c.bf16 %v33_v59, %v32_v58  ;;  %v34_v61 = vld [vmem:[%s3755_s1 + $0x70] sm:$0xff]  ;;  %vm112_vm8 = vcmp.ge.s32.totalorder %v3562_v45, 8  ;;  %vm115_vm9 = vcmp.lt.s32.totalorder %v3562_v45, 16  ;;  %v36_v59 = vld [vmem:[%s3755_s1 + $0x80] sm:$0xff] }
 0x362   :  { %vm3566_vm10 = vmand %vm112_vm8, %vm115_vm9  ;;  %vm105_vm11 = vcmp.lt.s32.totalorder %v3562_v45, 8 }
 0x363   :  { %3103 = vrcp.f32 %v800_v63  ;;  %2979 = vmatprep.subr.bf16.mxu0 %v3500_v60  ;;  %v3510_v63 = vpack.c.bf16 %v35_v62, %v34_v61  ;;  %v37_v61 = vld [vmem:[%s3755_s1 + $0x88] sm:$0xff]  ;;  %v38_v62 = vld [vmem:[%s3755_s1 + $0x90] sm:$0xff] }
 0x364   :  { %3105 = vrcp.f32 %v801_v0  ;;  %2981 = vmatpush3.bf16.msra.mxu0 %v3500_v60  ;;  %v2453_v0 = vld [vmem:[%s3757_s3 + $0x3] ss:$0 sm:$0xff] }
 0x365   :  { %2983 = vmatprep.subr.bf16.mxu0 %v3510_v63 }
 0x368   :  { %2985 = vmatpush3.bf16.msra.mxu0 %v3510_v63 }
 0x36d   :  { %v3104_v11 = vpop.eup %3103 }
 0x36e   :  { %808 = vrot.lane.b32.xlu1 %v3104_v11, %s3164_s16  ;;  %v3106_v12 = vpop.eup %3105 }
 0x372   :  { %810 = vrot.lane.b32.xlu1 %v3106_v12, %s3164_s16 }
 0x3e0   :  { %v809_v21 = vpop.permute.xlu1 %808 }
 0x3e1   :  { %v814_v23 = vmul.f32 %v3065_v55, %v809_v21  ;;  %v1192_v55 = vld [vmem:[%s3756_s2 + $0x118] sm:$0xff] }
 0x3e2   :  { %v2974_v57 = vpack.c.bf16 %v1192_v55, %v1191_v54 }
 0x3e3   :  { %v816_v22 = vadd.f32 %v814_v23, %v3328_v15  ;;  %v1007_v15 = vmul.f32 %v3437_v31, %v1006_v32 }
 0x3e4   :  { %v811_v28 = vpop.permute.xlu1 %810 }
 0x3e5   :  { %v818_v29 = vmul.f32 0.70710677, %v816_v22  ;;  %v815_v30 = vmul.f32 %v3064_v53, %v811_v28  ;;  %v1098_v53 = vsel %vm216_vm2, %v1096_v40, %v1097_v39 }
 0x3e6   :  { %v1101_v56 = vmul.f32 %v3256_v27, %v1098_v53 }
 0x3e7   :  { %v817_v35 = vadd.f32 %v815_v30, %v3331_v19  ;;  %2719 = vmatprep.mubr.msk.f32.mxu1 %vm126_vm0, %v818_v29  ;;  %v2962_v19 = vpack.c.bf16 %v1103_v38, %v1102_v37 }
 0x3e9   :  { %v819_v36 = vmul.f32 0.70710677, %v817_v35 }
 0x3eb   :  { %2720 = vmatmul.mubr.msk.f32.vlgmr.msra.gmra.mrb[2].mxu1 %vm126_vm0, %v819_v36 }
 0x3ec   :  { %2957 = vmatpush3.bf16.msra.mxu1 %v2954_v10  ;;  %2741 = vmatprep.mubr.msk.f32.mxu1 %vm126_vm0, %v1007_v15 }
 0x3ed   :  { %2959 = vmatprep.subr.bf16.mxu1 %v2958_v26 }
 0x3f0   :  { %2961 = vmatpush3.bf16.msra.mxu1 %v2958_v26  ;;  %v3552_v26 = vld [vmem:[%s3757_s3 + $0x7] ss:$0 sm:$0xff] }
 0x3f1   :  { %2963 = vmatprep.subr.bf16.mxu1 %v2962_v19 }
 0x3f3   :  { %2742 = vmatmul.mubr.msk.f32.vlgmr.msra.gmra.mrb[4].mxu1 %vm126_vm0, %v1008_v46 }
 0x3f4   :  { %2965 = vmatpush3.bf16.msra.mxu1 %v2962_v19  ;;  %2752 = vmatprep.mubr.msk.f32.mxu1 %vm126_vm0, %v1100_v48 }
 0x3f5   :  { %2967 = vmatprep.subr.bf16.mxu1 %v2966_v47 }
 0x3f8   :  { %2969 = vmatpush3.bf16.msra.mxu1 %v2966_v47 }
 0x3f9   :  { %2971 = vmatprep.subr.bf16.mxu1 %v2970_v52 }
 0x3fb   :  { %2753 = vmatmul.mubr.msk.f32.vlgmr.msra.gmra.mrb[4].mxu1 %vm126_vm0, %v1101_v56 }
 0x3fc   :  { %2973 = vmatpush3.bf16.msra.mxu1 %v2970_v52  ;;  %2763 = vmatprep.mubr.msk.f32.mxu1 %vm126_vm0, %v3429_v16 }
 0x3fd   :  { %2975 = vmatprep.subr.bf16.mxu1 %v2974_v57 }
 0x400   :  { %2977 = vmatpush3.bf16.msra.mxu1 %v2974_v57 }
 0x403   :  { %2764 = vmatmul.mubr.msk.f32.vlgmr.msra.gmra.mrb[4].mxu1 %vm126_vm0, %v3427_v14 }
 0x4be   :  { %v2721_v1 = vpop.f32.mrb[2].mxu1 }
 0x4bf   :  { %v902_v2 = vadd.f32 %v2721_v1, %v2453_v0  ;;  %v896_v3 = vpop.f32.mrb[3].mxu1  ;;  %v39_v1 = vld [vmem:[%s3755_s1 + $0x98] sm:$0xff] }
 0x4c0   :  { %v897_v4 = vadd.f32 %v2453_v0, %v896_v3  ;;  %v3584_v0 = vpack.c.bf16 %v37_v61, %v36_v59  ;;  %v1860_v59 = vld [vmem:[%s3756_s2 + $0x178] sm:$0xff] }
 0x4c1   :  { %v906_v6 = vadd.f32 %v902_v2, %v3220_v7  ;;  %v2459_v7 = vld [vmem:[%s3757_s3 + $0x5] ss:$0 sm:$0xff] }
 0x4c2   :  { %v905_v9 = vadd.f32 %v897_v4, %v3213_v5  ;;  %v3525_v10 = vpack.c.bf16 %v902_v2, %v897_v4  ;;  %v3589_v2 = vpack.c.bf16 %v39_v1, %v38_v62  ;;  %2997 = vmatprep.subr.bf16.mxu1 %v3584_v0 }
 0x4c3   :  { %v908_v11 = vmul.f32 0.70710677, %v906_v6  ;;  %2999 = vmatpush3.bf16.msra.mxu1 %v3584_v0 }
 0x4c4   :  { %v907_v12 = vmul.f32 0.70710677, %v905_v9  ;;  %2988 = vmatprep.subr.msk.bf16.mxu0 %vm3520_vm7, %v3525_v10  ;;  %3001 = vmatprep.subr.bf16.mxu1 %v3589_v2 }
 0x4c6   :  { %v3530_v13 = vpack.c.bf16 %v908_v11, %v907_v12 }
 0x4c7   :  { %3003 = vmatpush3.bf16.msra.mxu1 %v3589_v2 }
 0x4c8   :  { %3029 = vmatprep.subr.bf16.mxu1 %v3500_v60 }
 0x4d6   :  { %v2765_v20 = vpop.f32.mrb[4].mxu1 }
 0x4d7   :  { %v3066_v21 = vadd.f32 %v2765_v20, %v2459_v7  ;;  %v1265_v23 = vpop.f32.mrb[5].mxu1 }
 0x4d8   :  { %v3067_v24 = vadd.f32 %v2459_v7, %v1265_v23  ;;  %v1678_v23 = vld [vmem:[%s3756_s2 + $0x128] sm:$0xff] }
 0x4d9   :  { %v2467_v25 = vmul.f32 -1.442695, %v3066_v21 }
 0x4da   :  { %v2466_v5 = vmul.f32 -1.442695, %v3067_v24 }
 0x4db   :  { %3107 = vpow2.f32 %v2467_v25 }
 0x4dc   :  { %3109 = vpow2.f32 %v2466_v5  ;;  %v1770_v5 = vld [vmem:[%s3756_s2 + $0x140] sm:$0xff] }
 0x4e5   :  { %v3108_v22 = vpop.eup %3107 }
 0x4e6   :  { %v3110_v28 = vpop.eup %3109  ;;  %v1283_v29 = vadd.f32 1.0, %v3108_v22  ;;  %v1771_v22 = vld [vmem:[%s3756_s2 + $0x148] sm:$0xff] }
 0x4e7   :  { %v1282_v30 = vadd.f32 1.0, %v3110_v28  ;;  %v3012_v28 = vpack.c.bf16 %v1771_v22, %v1770_v5 }
 0x4e8   :  { %3111 = vrcp.f32 %v1283_v29  ;;  %v3625_v29 = vld [vmem:[%s3757_s3 + $0x8] ss:$0 sm:$0xff] }
 0x4e9   :  { %3113 = vrcp.f32 %v1282_v30 }
 0x4f2   :  { %v3112_v32 = vpop.eup %3111 }
 0x4f3   :  { %v3114_v33 = vpop.eup %3113  ;;  %1292 = vrot.lane.b32.xlu1 %v3112_v32, %s3164_s16 }
 0x4f4   :  { %1290 = vrot.lane.b32.xlu0 %v3114_v33, %s3164_s16 }
 0x565   :  { %v1293_v34 = vpop.permute.xlu1 %1292 }
 0x566   :  { %v1291_v35 = vpop.permute.xlu0 %1290  ;;  %v3539_v36 = vmul.f32 %v3066_v21, %v1293_v34  ;;  %v1677_v21 = vld [vmem:[%s3756_s2 + $0x120] sm:$0xff] }
 0x567   :  { %v3537_v15 = vmul.f32 %v3067_v24, %v1291_v35  ;;  %v3004_v24 = vpack.c.bf16 %v1678_v23, %v1677_v21 }
 0x569   :  { %2774 = vmatprep.mubr.msk.f32.mxu0 %vm126_vm0, %v3537_v15 }
 0x56a   :  { %2775 = vmatmul.mubr.msk.f32.vlgmr.msra.gmra.mrb[6].mxu0 %vm126_vm0, %v3539_v36 }
 0x56b   :  { %2991 = vmatpush3.bf16.xpose.msk.msra.mxu0 %vm3520_vm7, %v3525_v10 }
 0x56c   :  { %2993 = vmatprep.subr.bf16.mxu0 %v3530_v13 }
 0x63d   :  { %v2776_v37 = vpop.f32.mrb[6].mxu0 }
 0x63e   :  { %v1380_v38 = vadd.f32 %v2776_v37, %v3552_v26  ;;  %v1374_v39 = vpop.f32.mrb[7].mxu0 }
 0x63f   :  { %v1375_v40 = vadd.f32 %v3552_v26, %v1374_v39 }
 0x640   :  { %v1384_v19 = vadd.f32 %v1380_v38, %v3397_v51 }
 0x641   :  { %v1383_v41 = vadd.f32 %v1375_v40, %v3389_v50 }
 0x642   :  { %v1386_v43 = vmul.f32 0.70710677, %v1384_v19 }
 0x643   :  { %v1385_v42 = vmul.f32 0.70710677, %v1383_v41 }
 0x645   :  { %2781 = vmatprep.mubr.msk.f32.mxu0 %vm126_vm0, %v1385_v42 }
 0x646   :  { %2782 = vmatmul.mubr.msk.f32.vlgmr.msra.gmra.mrb[8].mxu0 %vm126_vm0, %v1386_v43 }
 0x647   :  { %2995 = vmatpush3.bf16.msra.mxu0 %v3530_v13 }
 0x648   :  { %3005 = vmatprep.subr.bf16.mxu0 %v3004_v24 }
 0x719   :  { %v2783_v47 = vpop.f32.mrb[8].mxu0 }
 0x71a   :  { %v1468_v48 = vpop.f32.mrb[9].mxu0  ;;  %v1478_v49 = vsel %vm3566_vm10, %v2783_v47, -1e+30 }
 0x71b   :  { %1481 = vmax.xlane.f32.xlu1 %v1478_v49  ;;  %v1477_v17 = vsel %vm105_vm11, %v1468_v48, -1e+30 }
 0x71c   :  { %1479 = vmax.xlane.f32.xlu0 %v1477_v17 }
 0x7a8   :  { %v1482_v44 = vpop.xlane.xlu1 %1481 }
 0x7a9   :  { %v1480_v52 = vpop.xlane.xlu0 %1479  ;;  %v1484_v53 = vsub.f32 %v1478_v49, %v1482_v44 }
 0x7aa   :  { %v1483_v54 = vsub.f32 %v1477_v17, %v1480_v52 }
 0x7ab   :  { %v1487_v56 = vmul.f32 1.442695, %v1484_v53 }
 0x7ac   :  { %v1485_v55 = vmul.f32 1.442695, %v1483_v54 }
 0x7ae   :  { %3115 = vpow2.f32 %v1485_v55  ;;  %v1857_v55 = vld [vmem:[%s3756_s2 + $0x160] sm:$0xff] }
 0x7af   :  { %3117 = vpow2.f32 %v1487_v56  ;;  %v1858_v56 = vld [vmem:[%s3756_s2 + $0x168] sm:$0xff] }
 0x7b8   :  { %v3116_v57 = vpop.eup %3115 }
 0x7b9   :  { %1489 = vadd.xlane.f32.xlu0 %v3116_v57  ;;  %v3118_v58 = vpop.eup %3117 }
 0x7bd   :  { %1491 = vadd.xlane.f32.xlu0 %v3118_v58 }
 0x846   :  { %v1490_v3 = vpop.xlane.xlu0 %1489 }
 0x847   :  { %3119 = vrcp.f32 %v1490_v3 }
 0x84a   :  { %v1492_v4 = vpop.xlane.xlu0 %1491 }
 0x84b   :  { %3121 = vrcp.f32 %v1492_v4 }
 0x851   :  { %v3120_v6 = vpop.eup %3119 }
 0x852   :  { %v1495_v9 = vmul.f32 %v3120_v6, %v3116_v57 }
 0x854   :  { %2788 = vmatprep.mubr.f32.mxu0 %v1495_v9 }
 0x855   :  { %v3122_v11 = vpop.eup %3121 }
 0x856   :  { %v1496_v12 = vmul.f32 %v3122_v11, %v3118_v58  ;;  %v1859_v58 = vld [vmem:[%s3756_s2 + $0x170] sm:$0xff] }
 0x857   :  { %v3024_v62 = vpack.c.bf16 %v1860_v59, %v1859_v58 }
 0x858   :  { %2789 = vmatmul.mubr.f32.vlgmr.msra.gmra.mrb[10].mxu0 %v1496_v12 }
 0x859   :  { %3007 = vmatpush3.bf16.msra.mxu0 %v3004_v24 }
 0x92b   :  { %v2790_v7 = vpop.f32.mrb[10].mxu0 }
 0x92c   :  { %v1563_v20 = vpop.f32.mrb[11].mxu0 }
 0x92d   :  { %2799 = vmatprep.mubr.msk.f32.mxu1 %vm126_vm0, %v1563_v20 }
 0x92e   :  { %2800 = vmatmul.mubr.msk.f32.vlgmr.msra.gmra.mrb[6].mxu1 %vm126_vm0, %v2790_v7 }
 0x92f   :  { %3031 = vmatpush3.bf16.msra.mxu1 %v3500_v60  ;;  %v1679_v60 = vld [vmem:[%s3756_s2 + $0x130] sm:$0xff] }
 0x930   :  { %3033 = vmatprep.subr.bf16.mxu1 %v3510_v63 }
 0x933   :  { %3035 = vmatpush3.bf16.msra.mxu1 %v3510_v63  ;;  %v1680_v63 = vld [vmem:[%s3756_s2 + $0x138] sm:$0xff] }
 0x934   :  { %3038 = vmatprep.subr.msk.bf16.mxu1 %vm3520_vm7, %v3525_v10  ;;  %v3008_v25 = vpack.c.bf16 %v1680_v63, %v1679_v60 }
 0x936   :  { %3009 = vmatprep.subr.bf16.mxu0 %v3008_v25 }
 0x937   :  { %3011 = vmatpush3.bf16.msra.mxu0 %v3008_v25 }
 0x938   :  { %3013 = vmatprep.subr.bf16.mxu0 %v3012_v28 }
 0xa01   :  { %v2801_v30 = vpop.f32.mrb[6].mxu1 }
 0xa02   :  { %v1654_v32 = vadd.f32 %v2801_v30, %v3625_v29  ;;  %v1648_v33 = vpop.f32.mrb[7].mxu1 }
 0xa03   :  { %v1649_v34 = vadd.f32 %v3625_v29, %v1648_v33 }
 0xa04   :  { %v1658_v35 = vadd.f32 %v1654_v32, %v3539_v36 }
 0xa05   :  { %v1657_v37 = vadd.f32 %v1649_v34, %v3537_v15  ;;  %v1772_v15 = vld [vmem:[%s3756_s2 + $0x150] sm:$0xff] }
 0xa06   :  { %v1660_v38 = vmul.f32 0.70710677, %v1658_v35 }
 0xa07   :  { %v1659_v39 = vmul.f32 0.70710677, %v1657_v37 }
 0xa08   :  { %v1662_v40 = vadd.f32 %v1660_v38, %v3427_v14  ;;  %v1773_v14 = vld [vmem:[%s3756_s2 + $0x158] sm:$0xff] }
 0xa09   :  { %v1661_v19 = vadd.f32 %v1659_v39, %v3429_v16  ;;  %v3016_v53 = vpack.c.bf16 %v1773_v14, %v1772_v15  ;;  %v40_v14 = vld [vmem:[%s3755_s1 + $0xa0] sm:$0xff] }
 0xa0a   :  { %v3633_v41 = vmul.f32 0.70710677, %v1662_v40 }
 0xa0b   :  { %v3635_v42 = vmul.f32 0.70710677, %v1661_v19 }
 0xa0c   :  { %v1672_v43 = vrot.slane %v3633_v41, 6  ;;  %v1765_v47 = vrot.slane %v3633_v41, 7 }
 0xa0d   :  { %v1671_v48 = vrot.slane %v3635_v42, 6  ;;  %v1764_v36 = vrot.slane %v3635_v42, 7 }
 0xa0f   :  { %v1674_v16 = vsel %vm1004_vm6, %v1672_v43, %v1671_v48  ;;  %v1673_v49 = vsel %vm1004_vm6, %v1671_v48, %v1672_v43  ;;  %v1767_v17 = vsel %vm216_vm2, %v1765_v47, %v1764_v36  ;;  %v1766_v57 = vsel %vm216_vm2, %v1764_v36, %v1765_v47 }
 0xa10   :  { %v1675_v44 = vmul.f32 %v3437_v31, %v1674_v16  ;;  %v1676_v52 = vmul.f32 %v3437_v31, %v1673_v49  ;;  %v1768_v54 = vmul.f32 %v3256_v27, %v1767_v17  ;;  %v3020_v31 = vpack.c.bf16 %v1858_v56, %v1857_v55  ;;  %v41_v16 = vld [vmem:[%s3755_s1 + $0xa8] sm:$0xff]  ;;  %v42_v17 = vld [vmem:[%s3755_s1 + $0xb0] sm:$0xff] }
 0xa11   :  { %v1769_v61 = vmul.f32 %v3256_v27, %v1766_v57  ;;  %v3054_v49 = vpack.c.bf16 %v41_v16, %v40_v14 }
 0xa12   :  { %2810 = vmatprep.mubr.msk.f32.mxu0 %vm126_vm0, %v1675_v44  ;;  %v43_v44 = vld [vmem:[%s3755_s1 + $0xb8] sm:$0xff]  ;;  %s3165_s1 = smov [#allocation2]  }
 0xa13   :  { %2811 = vmatmul.mubr.msk.f32.vlgmr.msra.gmra.mrb[12].mxu0 %vm126_vm0, %v1676_v52  ;;  %v3058_v52 = vpack.c.bf16 %v43_v44, %v42_v17  ;;  %s2412_s12 = sshll.u32 %s3165_s1, 4  ;;  %s2413_s12 = int_to_ptr.vmem [resolvable:$true] %s2412_s12 }
 0xa14   :  { %3015 = vmatpush3.bf16.msra.mxu0 %v3012_v28  ;;  %2821 = vmatprep.mubr.msk.f32.mxu0 %vm126_vm0, %v1768_v54  ;;  %s3139_s13 = scalar_lea.vmem %s2413_s12, 256  ;;  %p3144_p1 = scmp.lt.s32.totalorder %s2413_s12, %s2413_s12 }
 0xa15   :  { %3017 = vmatprep.subr.bf16.mxu0 %v3016_v53  ;;  %p3140_p0 = scmp.ne.s32.totalorder %s2413_s12, %s3139_s13  ;;  %p3145_p2 = scmp.lt.s32.totalorder %s3139_s13, %s3139_s13 }
 0xa17   :  { %p3146_p3 = por %p3145_p2, %p3144_p1 }
 0xa18   :  { %3019 = vmatpush3.bf16.msra.mxu0 %v3016_v53 }
 0xa19   :  { %3021 = vmatprep.subr.bf16.mxu0 %v3020_v31  ;;  %p3147_p4 = pnand %p3146_p3, %p3140_p0 }
 0xa1b   :  { %2822 = vmatmul.mubr.msk.f32.vlgmr.msra.gmra.mrb[12].mxu0 %vm126_vm0, %v1769_v61 }
 0xa1c   :  { %3023 = vmatpush3.bf16.msra.mxu0 %v3020_v31  ;;  %2832 = vmatprep.mubr.msk.f32.mxu0 %vm126_vm0, %v3635_v42 }
 0xa1d   :  { %3025 = vmatprep.subr.bf16.mxu0 %v3024_v62 }
 0xa20   :  { %3027 = vmatpush3.bf16.msra.mxu0 %v3024_v62 }
 0xa21   :  { %3047 = vmatprep.subr.bf16.mxu0 %v3584_v0 }
 0xa23   :  { %2833 = vmatmul.mubr.msk.f32.vlgmr.msra.gmra.mrb[12].mxu0 %vm126_vm0, %v3633_v41 }
 0xa24   :  { %3049 = vmatpush3.bf16.msra.mxu0 %v3584_v0 }
 0xa25   :  { %3051 = vmatprep.subr.bf16.mxu0 %v3589_v2 }
 0xa28   :  { %3053 = vmatpush3.bf16.msra.mxu0 %v3589_v2 }
 0xaf6   :  { %v2834_v27 = vpop.f32.mrb[12].mxu0 }
 0xaf7   :  { %v3068_v1 = vadd.f32 %v2834_v27, %v2478_v18  ;;  %v1933_v3 = vpop.f32.mrb[13].mxu0 }
 0xaf8   :  { %v3069_v4 = vadd.f32 %v2478_v18, %v1933_v3 }
 0xaf9   :  { %v2486_v6 = vmul.f32 -1.442695, %v3068_v1 }
 0xafa   :  { %v2485_v9 = vmul.f32 -1.442695, %v3069_v4 }
 0xafb   :  { %3123 = vpow2.f32 %v2486_v6 }
 0xafc   :  { %3125 = vpow2.f32 %v2485_v9 }
 0xb05   :  { %v3124_v11 = vpop.eup %3123 }
 0xb06   :  { %v3126_v12 = vpop.eup %3125  ;;  %v1951_v7 = vadd.f32 1.0, %v3124_v11 }
 0xb07   :  { %v1950_v0 = vadd.f32 1.0, %v3126_v12 }
 0xb08   :  { %3127 = vrcp.f32 %v1951_v7 }
 0xb09   :  { %3129 = vrcp.f32 %v1950_v0 }
 0xb12   :  { %v3128_v20 = vpop.eup %3127 }
 0xb13   :  { %v3130_v2 = vpop.eup %3129  ;;  %1960 = vrot.lane.b32.xlu0 %v3128_v20, %s3164_s16 }
 0xb14   :  { %1958 = vrot.lane.b32.xlu1 %v3130_v2, %s3164_s16 }
 0xb85   :  { %v1961_v21 = vpop.permute.xlu0 %1960 }
 0xb86   :  { %v1959_v23 = vpop.permute.xlu1 %1958  ;;  %v3690_v60 = vmul.f32 %v3068_v1, %v1961_v21 }
 0xb87   :  { %v3688_v24 = vmul.f32 %v3069_v4, %v1959_v23 }
 0xb89   :  { %2843 = vmatprep.mubr.msk.f32.mxu1 %vm126_vm0, %v3688_v24 }
 0xb8a   :  { %2844 = vmatmul.mubr.msk.f32.vlgmr.msra.gmra.mrb[8].mxu1 %vm126_vm0, %v3690_v60 }
 0xb8b   :  { %3041 = vmatpush3.bf16.xpose.msk.msra.mxu1 %vm3520_vm7, %v3525_v10 }
 0xb8c   :  { %3043 = vmatprep.subr.bf16.mxu1 %v3530_v13 }
 0xc5d   :  { %v2845_v63 = vpop.f32.mrb[8].mxu1 }
 0xc5e   :  { %v2044_v25 = vadd.f32 %v2845_v63, %v3552_v26  ;;  %v2038_v5 = vpop.f32.mrb[9].mxu1 }
 0xc5f   :  { %v2039_v22 = vadd.f32 %v3552_v26, %v2038_v5 }
 0xc60   :  { %v2048_v28 = vadd.f32 %v2044_v25, %v3397_v51 }
 0xc61   :  { %v2047_v30 = vadd.f32 %v2039_v22, %v3389_v50 }
 0xc62   :  { %v2050_v33 = vmul.f32 0.70710677, %v2048_v28 }
 0xc63   :  { %v2049_v32 = vmul.f32 0.70710677, %v2047_v30 }
 0xc65   :  { %2850 = vmatprep.mubr.msk.f32.mxu1 %vm126_vm0, %v2049_v32 }
 0xc66   :  { %2851 = vmatmul.mubr.msk.f32.vlgmr.msra.gmra.mrb[10].mxu1 %vm126_vm0, %v2050_v33 }
 0xc67   :  { %3045 = vmatpush3.bf16.msra.mxu1 %v3530_v13 }
 0xc68   :  { %3055 = vmatprep.subr.bf16.mxu1 %v3054_v49 }
 0xd39   :  { %v2852_v8 = vpop.f32.mrb[10].mxu1 }
 0xd3a   :  { %v2123_v10 = vpop.f32.mrb[11].mxu1  ;;  %v2133_v34 = vsel %vm3566_vm10, %v2852_v8, -1e+30 }
 0xd3b   :  { %2136 = vmax.xlane.f32.xlu0 %v2133_v34  ;;  %v2132_v26 = vsel %vm105_vm11, %v2123_v10, -1e+30 }
 0xd3c   :  { %2134 = vmax.xlane.f32.xlu1 %v2132_v26 }
 0xdc8   :  { %v2137_v51 = vpop.xlane.xlu0 %2136 }
 0xdc9   :  { %v2139_v50 = vsub.f32 %v2133_v34, %v2137_v51  ;;  %v2135_v35 = vpop.xlane.xlu1 %2134 }
 0xdca   :  { %v2138_v37 = vsub.f32 %v2132_v26, %v2135_v35 }
 0xdcb   :  { %v2142_v38 = vmul.f32 1.442695, %v2139_v50 }
 0xdcc   :  { %v2140_v39 = vmul.f32 1.442695, %v2138_v37 }
 0xdcd   :  { %3131 = vpow2.f32 %v2142_v38 }
 0xdce   :  { %3133 = vpow2.f32 %v2140_v39 }
 0xdd7   :  { %v3132_v40 = vpop.eup %3131 }
 0xdd8   :  { %v3134_v13 = vpop.eup %3133  ;;  %2146 = vadd.xlane.f32.xlu0 %v3132_v40 }
 0xdd9   :  { %2144 = vadd.xlane.f32.xlu1 %v3134_v13 }
 0xe65   :  { %v2147_v19 = vpop.xlane.xlu0 %2146 }
 0xe66   :  { %3135 = vrcp.f32 %v2147_v19  ;;  %v2145_v46 = vpop.xlane.xlu1 %2144 }
 0xe67   :  { %3137 = vrcp.f32 %v2145_v46 }
 0xe70   :  { %v3136_v43 = vpop.eup %3135 }
 0xe71   :  { %v3138_v45 = vpop.eup %3137  ;;  %v2151_v47 = vmul.f32 %v3136_v43, %v3132_v40 }
 0xe72   :  { %v2150_v48 = vmul.f32 %v3138_v45, %v3134_v13 }
 0xe73   :  { %2404 = vst [vmem:[#allocation2 + $0x8] sm:$0xff] %v2151_v47 }
 0xe74   :  { %2857 = vmatprep.mubr.f32.mxu1 %v2150_v48  ;;  %2403 = vst [vmem:[#allocation2] sm:$0xff] %v2150_v48 }
 0xe75   :  { %2858 = vmatmul.mubr.f32.vlgmr.msra.gmra.mrb[12].mxu1 %v2151_v47 }
 0xe76   :  { %3057 = vmatpush3.bf16.msra.mxu1 %v3054_v49 }
 0xe77   :  { %3059 = vmatprep.subr.bf16.mxu1 %v3058_v52 }
 0xe7a   :  { %3061 = vmatpush3.bf16.msra.mxu1 %v3058_v52 }
 0xf48   :  { %v2859_v36 = vpop.f32.mrb[12].mxu1 }
 0xf49   :  { %v2218_v15 = vpop.f32.mrb[13].mxu1 }
 0xf4a   :  { %2868 = vmatprep.mubr.msk.f32.mxu0 %vm126_vm0, %v2218_v15 }
 0xf4b   :  { %2869 = vmatmul.mubr.msk.f32.vlgmr.msra.gmra.mrb[14].mxu0 %vm126_vm0, %v2859_v36 }
0x101e   :  { %v2870_v53 = vpop.f32.mrb[14].mxu0 }
0x101f   :  { %v2305_v54 = vadd.f32 %v2870_v53, %v3625_v29  ;;  %v2299_v55 = vpop.f32.mrb[15].mxu0 }
0x1020   :  { %v2300_v56 = vadd.f32 %v3625_v29, %v2299_v55 }
0x1021   :  { %v2309_v31 = vadd.f32 %v2305_v54, %v3690_v60 }
0x1022   :  { %v2308_v57 = vadd.f32 %v2300_v56, %v3688_v24 }
0x1023   :  { %v2311_v58 = vmul.f32 0.70710677, %v2309_v31 }
0x1024   :  { %v2310_v59 = vmul.f32 0.70710677, %v2308_v57 }
0x1025   :  { %v2313_v61 = vadd.f32 %v2311_v58, %v3633_v41 }
0x1026   :  { %v2312_v62 = vadd.f32 %v2310_v59, %v3635_v42 }
0x1027   :  { %v2315_v27 = vmul.f32 0.70710677, %v2313_v61 }
0x1028   :  { %v2314_v18 = vmul.f32 0.70710677, %v2312_v62 }
0x102a   :  { %2879 = vmatprep.mubr.msk.f32.mxu1 %vm126_vm0, %v2314_v18 }
0x102b   :  { %2880 = vmatmul.mubr.msk.f32.vlgmr.msra.gmra.mrb[14].mxu1 %vm126_vm0, %v2315_v27 }
0x102c   :  { %3150 = shalt.err (!%p3147_p4)
}
0x102d   :  { %s3151_s17 = scalar_lea.hbm %s3759_s5, 256 }
0x102e   :  { %p3152_p5 = scmp.ne.s32.totalorder %s3759_s5, %s3151_s17  ;;  %p3155_p6 = scmp.lt.u32.totalorder %s3151_s17, %s3759_s5 }
0x1030   :  { %p3157_p7 = pnand %p3155_p6, %p3152_p5 }
0x1032   :  { %3160 = shalt.err (!%p3157_p7)
}
0x1033   :  { %s3166_s22 = smov 128   ;;  %s3167_s23 = smov 8   ;;  %v2495_v29 = vld [vmem:[%s3757_s3 + $0x9] ss:$0 sm:$0xff] }
0x1034   :  { %2418 = dma.vmem_to_hbm [thread:$0]  %s2413_s12, 256, %s3759_s5, [#allocation3], %s3166_s22, %s3166_s22, %s3167_s23  }
0x10fe   :  { %v2881_v41 = vpop.f32.mrb[14].mxu1 }
0x10ff   :  { %v2398_v42 = vadd.f32 %v2881_v41, %v2495_v29  ;;  %v2392_v1 = vpop.f32.mrb[15].mxu1 }
0x1100   :  { %v2393_v3 = vadd.f32 %v2495_v29, %v2392_v1 }
0x1101   :  { %2402 = vst [vmem:[%s3758_s4 + $0x8] sm:$0xff] %v2398_v42 }
0x1102   :  { %2401 = vst [vmem:[%s3758_s4] sm:$0xff] %v2393_v3 }
0x1103   :  { %3161 = dma.done.wait [#allocation3], 256  }
0x1104   :  { %3162 = vsyncadd [#allocation3], 4294967040 }
0x1105   :  { %2424 = vsyncpa [#allocation3], 1 }

</bundles_post_ra>
